<compile_context>
chip_gen: v5e
topology: v5e:2x2
jax: 0.10.0
libtpu: 0.0.40
codegen_flags: <defaults>
</compile_context>

<pallas_src>
import functools

import jax
import jax.numpy as jnp
from jax import lax
from jax.experimental import pallas as pl
from jax.experimental.pallas import tpu as pltpu


def _round_up(x, m):
    return (x + m - 1) // m * m


def _layernorm_store(acc, gb_ref, o_ref, *, eps, n_valid, n_pad):
    """LayerNorm over the valid channel lanes (PyTorch semantics: biased var, eps in sqrt)."""
    if n_valid == n_pad:
        mean = jnp.mean(acc, axis=-1, keepdims=True)
        cen = acc - mean
        var = jnp.mean(cen * cen, axis=-1, keepdims=True)
    else:
        lane = lax.broadcasted_iota(jnp.int32, acc.shape, 1)
        mask = lane < n_valid
        inv_n = jnp.float32(1.0 / n_valid)
        mean = jnp.sum(jnp.where(mask, acc, 0.0), axis=-1, keepdims=True) * inv_n
        cen = jnp.where(mask, acc - mean, 0.0)
        var = jnp.sum(cen * cen, axis=-1, keepdims=True) * inv_n
    xn = cen * lax.rsqrt(var + jnp.float32(eps))      # rsqrt lands in the EUP slot
    o_ref[...] = (xn * gb_ref[0:1, :] + gb_ref[1:2, :]).astype(o_ref.dtype)


def _downsample_kernel(t_ref, w_ref, gb_ref, o_ref, *scratch,
                       eps, n_valid, n_pad, n_k):
    """Fused conv-as-matmul: [tm, K_chunk] x [K_chunk, N_pad] (+ K-tiling) + LayerNorm."""
    if n_k == 1:
        acc = jnp.dot(t_ref[...], w_ref[...], preferred_element_type=jnp.float32)
        _layernorm_store(acc, gb_ref, o_ref, eps=eps, n_valid=n_valid, n_pad=n_pad)
    else:
        acc_ref = scratch[0]
        k = pl.program_id(1)

        @pl.when(k == 0)
        def _init():
            acc_ref[...] = jnp.zeros_like(acc_ref)

        acc_ref[...] += jnp.dot(t_ref[...], w_ref[...],
                                preferred_element_type=jnp.float32)

        @pl.when(k == n_k - 1)
        def _finalize():
            _layernorm_store(acc_ref[...], gb_ref, o_ref,
                             eps=eps, n_valid=n_valid, n_pad=n_pad)


def _vmem_budget_bytes():
    try:
        cap = int(pltpu.get_tpu_info().vmem_capacity_bytes)
    except Exception:
        cap = 64 * 2 ** 20          # conservative (v7x-class) if query unavailable
    return min(100 * 2 ** 20, int(cap * 0.9))


def _estimate_vmem_bytes(tm, tk, n_k, n_pad, mxu_isz, out_isz):
    taps = 2 * tm * tk * mxu_isz                         # double-buffered tap tile
    weight = (1 if n_k == 1 else 2) * tk * n_pad * mxu_isz
    gb = 8 * n_pad * 4                                   # sublane-padded gamma/beta
    out = 2 * tm * n_pad * out_isz                       # double-buffered out tile
    acc = tm * n_pad * 4 if n_k > 1 else 0               # f32 accumulator scratch
    temps = 2 * tm * n_pad * 4                           # LayerNorm intermediates headroom
    return taps + weight + gb + out + acc + temps


def _plan_tiling(M, C, n_pad, mxu_isz, out_isz, budget):
    """Pick (tm, number of K chunks).  Prefer big lane-dense tiles, un-tiled K."""
    K = 9 * C
    tm_cap = _round_up(max(M, 8), 8)
    prefer = 512 if budget >= 80 * 2 ** 20 else 256      # v5e/v6e: 512, v7x: 256
    cands = [t for t in (prefer, 256, 128, 64, 32, 16, 8) if t <= tm_cap]
    if tm_cap <= prefer and tm_cap not in cands:
        cands.append(tm_cap)
    cands = sorted(set(cands), reverse=True)
    # K chunks must keep the tap/weight block lane-aligned (multiple of 128).
    nk_opts = [1] + ([3, 9] if C % 128 == 0 else [])
    for tm in cands:
        for n_k in nk_opts:
            if _estimate_vmem_bytes(tm, K // n_k, n_k, n_pad,
                                    mxu_isz, out_isz) <= 0.85 * budget:
                return tm, n_k
    return cands[-1], nk_opts[-1]                        # best effort


def conv_downsampler_pallas(x, conv_w, gamma, beta, *, eps=1e-5,
                            use_bf16_matmul=False):
    """x: [B, H, W, C] NHWC.  conv_w: [2C, C, 3, 3] (PyTorch OIHW).  Returns [B, Ho, Wo, 2C]."""
    B, H, W, C = x.shape
    N = conv_w.shape[0]                                  # 2 * dim
    Ho = (H + 2 - 3) // 2 + 1
    Wo = (W + 2 - 3) // 2 + 1
    M = B * Ho * Wo
    K = 9 * C
    N_pad = _round_up(N, 128)

    mxu_dtype = (jnp.bfloat16 if (use_bf16_matmul and x.dtype == jnp.float32)
                 else x.dtype)
    mxu_isz = jnp.dtype(mxu_dtype).itemsize
    out_isz = jnp.dtype(x.dtype).itemsize

    budget = _vmem_budget_bytes()
    tm, n_k = _plan_tiling(M, C, N_pad, mxu_isz, out_isz, budget)
    tk = K // n_k
    M_pad = _round_up(M, tm)
    grid_m = M_pad // tm

    # --- glue: 9 strided tap views of the zero-padded NHWC input, stacked along K so the
    # conv becomes a single [M, 9C] x [9C, N] matmul (im2col folded into the MXU dot). ---
    # TODO(synk): for small C (HBM-bound) read x_pad directly in-kernel (grid over output
    # row blocks, taps built with strided pl.ds) to remove the tap-stack HBM round-trip.
    x_pad = jnp.pad(x, ((0, 0), (1, 1), (1, 1), (0, 0)))
    taps = [x_pad[:, kh:kh + 2 * Ho - 1:2, kw:kw + 2 * Wo - 1:2, :]
            for kh in range(3) for kw in range(3)]       # each [B, Ho, Wo, C]
    tap = jnp.stack(taps, axis=3).reshape(M, K).astype(mxu_dtype)
    if M_pad != M:
        tap = jnp.pad(tap, ((0, M_pad - M), (0, 0)))

    # weight [2C, C, 3, 3] (OIHW) -> (kh, kw, in, out) -> [9C, N]; tap-major, channel-minor
    # matching the tap stacking above.  Pad output channels to N_pad (lane-dense stores).
    w2 = jnp.transpose(conv_w, (2, 3, 1, 0)).reshape(K, N).astype(mxu_dtype)
    if N_pad != N:
        w2 = jnp.pad(w2, ((0, 0), (0, N_pad - N)))

    # gamma/beta in one constant (2, N_pad) f32 block.
    gb = jnp.stack([jnp.pad(gamma.astype(jnp.float32), (0, N_pad - N)),
                    jnp.pad(beta.astype(jnp.float32), (0, N_pad - N))], axis=0)

    w_reads = 1 if n_k == 1 else grid_m
    cost = pl.CostEstimate(
        flops=2 * M_pad * K * N_pad,
        transcendentals=M_pad,
        bytes_accessed=(M_pad * K * mxu_isz + w_reads * K * N_pad * mxu_isz
                        + 2 * N_pad * 4 + M_pad * N_pad * out_isz))

    kernel = functools.partial(_downsample_kernel, eps=eps, n_valid=N,
                               n_pad=N_pad, n_k=n_k)
    scratch = [pltpu.VMEM((tm, N_pad), jnp.float32)] if n_k > 1 else []

    def build_call(single_buffer_consts):
        const_kw = ({"pipeline_mode": pl.Buffered(1)} if single_buffer_consts else {})
        if n_k == 1:  # weight index never changes -> resident, single-buffered
            w_spec = pl.BlockSpec((tk, N_pad), lambda i, k: (0, 0), **const_kw)
        else:         # weight streams with the K axis
            w_spec = pl.BlockSpec((tk, N_pad), lambda i, k: (k, 0))
        gb_spec = pl.BlockSpec((2, N_pad), lambda i, k: (0, 0), **const_kw)
        return pl.pallas_call(
            kernel,
            out_shape=jax.ShapeDtypeStruct((M_pad, N_pad), x.dtype),
            grid_spec=pltpu.PrefetchScalarGridSpec(
                num_scalar_prefetch=0,
                grid=(grid_m, n_k),
                in_specs=[
                    pl.BlockSpec((tm, tk), lambda i, k: (i, k)),   # tap tile
                    w_spec,                                        # weight
                    gb_spec,                                       # gamma/beta
                ],
                out_specs=pl.BlockSpec((tm, N_pad), lambda i, k: (i, 0)),
                scratch_shapes=scratch),
            compiler_params=pltpu.CompilerParams(
                dimension_semantics=("parallel", "arbitrary"),
                vmem_limit_bytes=int(budget)),
            cost_estimate=cost,
        )

    try:
        out = build_call(True)(tap, w2, gb)
    except Exception:
        # Fallback for environments without per-BlockSpec pipeline_mode support.
        out = build_call(False)(tap, w2, gb)

    return out[:M, :N].reshape(B, Ho, Wo, N)


def conv_downsampler_ref(x, conv_w, gamma, beta, eps=1e-5):
    """Pure-JAX reference mirroring the PyTorch forward."""
    x_nchw = jnp.transpose(x, (0, 3, 1, 2)).astype(jnp.float32)
    y = lax.conv_general_dilated(
        x_nchw, conv_w.astype(jnp.float32), window_strides=(2, 2),
        padding=((1, 1), (1, 1)), dimension_numbers=("NCHW", "OIHW", "NCHW"))
    y = jnp.transpose(y, (0, 2, 3, 1))  # NHWC
    mean = jnp.mean(y, axis=-1, keepdims=True)
    var = jnp.mean((y - mean) ** 2, axis=-1, keepdims=True)
    return (y - mean) * lax.rsqrt(var + eps) * gamma + beta


if __name__ == "__main__":
    key = jax.random.PRNGKey(0)
    B, H, W, dim = 2, 16, 16, 4

    k_x, k_w, k_g, k_b = jax.random.split(key, 4)
    x = jax.random.normal(k_x, (B, H, W, dim), dtype=jnp.float32)
    # nn.Conv2d(dim, 2*dim, 3, stride=2, padding=1, bias=False) weight: [2*dim, dim, 3, 3]
    conv_w = jax.random.normal(k_w, (2 * dim, dim, 3, 3), dtype=jnp.float32) * 0.1
    # nn.LayerNorm(2*dim) affine params
    gamma = 1.0 + 0.05 * jax.random.normal(k_g, (2 * dim,), dtype=jnp.float32)
    beta = 0.05 * jax.random.normal(k_b, (2 * dim,), dtype=jnp.float32)

    ref = conv_downsampler_ref(x, conv_w, gamma, beta)

    # f32 path.
    out = jax.block_until_ready(conv_downsampler_pallas(x, conv_w, gamma, beta))
    assert out.shape == (B, H // 2, W // 2, 2 * dim), out.shape
    assert jnp.allclose(out, ref, atol=1e-3, rtol=1e-3), float(jnp.max(jnp.abs(out - ref)))

    # bf16 path (native MXU dtype, f32 accumulation) -- looser tolerance.
    out_bf16 = jax.block_until_ready(
        conv_downsampler_pallas(x.astype(jnp.bfloat16), conv_w.astype(jnp.bfloat16),
                                gamma, beta))
    diff = jnp.max(jnp.abs(out_bf16.astype(jnp.float32) - ref))
    assert jnp.allclose(out_bf16.astype(jnp.float32), ref, atol=0.15, rtol=0.05), float(diff)

    print("KERNEL_OK")
</pallas_src>

<mosaic_0001>
module attributes {stable_mosaic.version = 11 : i64} {
  func.func @_downsample_kernel(%arg0: i32, %arg1: i32, %arg2: memref<128x36xf32, #tpu.memory_space<vmem>>, %arg3: memref<36x128xf32, #tpu.memory_space<vmem>>, %arg4: memref<2x128xf32, #tpu.memory_space<vmem>>, %arg5: memref<128x128xf32, #tpu.memory_space<vmem>>) attributes {dimension_semantics = [#tpu.dimension_semantics<parallel>, #tpu.dimension_semantics<arbitrary>], iteration_bounds = array<i64: 1, 1>, scalar_prefetch = 0 : i64, scratch_operands = 0 : i64, tpu.core_type = #tpu.core_type<tc>, window_params = [{transform_indices = @transform_0, window_bounds = array<i64: 128, 36>}, {pipeline_mode = #tpu.pipeline_mode<synchronous>, transform_indices = @transform_1, window_bounds = array<i64: 36, 128>}, {pipeline_mode = #tpu.pipeline_mode<synchronous>, transform_indices = @transform_2, window_bounds = array<i64: 2, 128>}, {transform_indices = @transform_3, window_bounds = array<i64: 128, 128>}]} {
    %c0 = arith.constant 0 : index
    %c0_0 = arith.constant 0 : index
    %0 = vector.load %arg2[%c0, %c0_0] : memref<128x36xf32, #tpu.memory_space<vmem>>, vector<128x36xf32>
    %c0_1 = arith.constant 0 : index
    %c0_2 = arith.constant 0 : index
    %1 = vector.load %arg3[%c0_1, %c0_2] : memref<36x128xf32, #tpu.memory_space<vmem>>, vector<36x128xf32>
    %cst = arith.constant dense<0.000000e+00> : vector<128x128xf32>
    %2 = tpu.matmul %0, %1, %cst {dimension_numbers = #tpu.dot_dimension_numbers<[1], [0], [0], [1], [0, 0, 1, 1], [], []>} : vector<128x36xf32>, vector<36x128xf32>, vector<128x128xf32> -> vector<128x128xf32>
    %3 = tpu.iota {dimensions = array<i32: 1>} : vector<128x128xi32>
    %c8_i32 = arith.constant 8 : i32
    %4 = vector.broadcast %c8_i32 : i32 to vector<128x128xi32>
    %5 = arith.cmpi slt, %3, %4 : vector<128x128xi32>
    %cst_3 = arith.constant 0.000000e+00 : f32
    %6 = vector.broadcast %cst_3 : f32 to vector<128x128xf32>
    %7 = arith.select %5, %2, %6 : vector<128x128xi1>, vector<128x128xf32>
    %cst_4 = arith.constant dense<0.000000e+00> : vector<128xf32>
    %8 = vector.multi_reduction <add>, %7, %cst_4 [1] : vector<128x128xf32> to vector<128xf32>
    %9 = vector.shape_cast %8 : vector<128xf32> to vector<128x1xf32>
    %cst_5 = arith.constant 1.250000e-01 : f32
    %10 = vector.broadcast %cst_5 : f32 to vector<128x1xf32>
    %11 = arith.mulf %9, %10 : vector<128x1xf32>
    %12 = vector.broadcast %11 : vector<128x1xf32> to vector<128x128xf32>
    %13 = arith.subf %2, %12 : vector<128x128xf32>
    %cst_6 = arith.constant 0.000000e+00 : f32
    %14 = vector.broadcast %cst_6 : f32 to vector<128x128xf32>
    %15 = arith.select %5, %13, %14 : vector<128x128xi1>, vector<128x128xf32>
    %16 = arith.mulf %15, %15 : vector<128x128xf32>
    %cst_7 = arith.constant dense<0.000000e+00> : vector<128xf32>
    %17 = vector.multi_reduction <add>, %16, %cst_7 [1] : vector<128x128xf32> to vector<128xf32>
    %18 = vector.shape_cast %17 : vector<128xf32> to vector<128x1xf32>
    %cst_8 = arith.constant 1.250000e-01 : f32
    %19 = vector.broadcast %cst_8 : f32 to vector<128x1xf32>
    %20 = arith.mulf %18, %19 : vector<128x1xf32>
    %cst_9 = arith.constant 9.99999974E-6 : f32
    %21 = vector.broadcast %cst_9 : f32 to vector<128x1xf32>
    %22 = arith.addf %20, %21 : vector<128x1xf32>
    %23 = math.rsqrt %22 : vector<128x1xf32>
    %24 = vector.broadcast %23 : vector<128x1xf32> to vector<128x128xf32>
    %25 = arith.mulf %15, %24 : vector<128x128xf32>
    %c0_10 = arith.constant 0 : index
    %c0_11 = arith.constant 0 : index
    %26 = vector.load %arg4[%c0_10, %c0_11] : memref<2x128xf32, #tpu.memory_space<vmem>>, vector<1x128xf32>
    %27 = vector.broadcast %26 : vector<1x128xf32> to vector<128x128xf32>
    %28 = arith.mulf %25, %27 : vector<128x128xf32>
    %c1 = arith.constant 1 : index
    %c0_12 = arith.constant 0 : index
    %29 = vector.load %arg4[%c1, %c0_12] : memref<2x128xf32, #tpu.memory_space<vmem>>, vector<1x128xf32>
    %30 = vector.broadcast %29 : vector<1x128xf32> to vector<128x128xf32>
    %31 = arith.addf %28, %30 : vector<128x128xf32>
    %c0_13 = arith.constant 0 : index
    %c0_14 = arith.constant 0 : index
    %32 = vector.load %arg5[%c0_13, %c0_14] : memref<128x128xf32, #tpu.memory_space<vmem>>, vector<128x128xf32>
    tpu.vector_store %arg5[%c0_13, %c0_14], %31 {strides = array<i32>} : memref<128x128xf32, #tpu.memory_space<vmem>>, vector<128x128xf32>,
    return
  }
  func.func @transform_0(%arg0: i32, %arg1: i32) -> (i32, i32) {
    %c0_i32 = arith.constant 0 : i32
    return %arg0, %arg1 : i32, i32
  }
  func.func @transform_1(%arg0: i32, %arg1: i32) -> (i32, i32) {
    %c0_i32 = arith.constant 0 : i32
    %c0_i32_0 = arith.constant 0 : i32
    %c0_i32_1 = arith.constant 0 : i32
    return %c0_i32, %c0_i32_0 : i32, i32
  }
  func.func @transform_2(%arg0: i32, %arg1: i32) -> (i32, i32) {
    %c0_i32 = arith.constant 0 : i32
    %c0_i32_0 = arith.constant 0 : i32
    %c0_i32_1 = arith.constant 0 : i32
    return %c0_i32, %c0_i32_0 : i32, i32
  }
  func.func @transform_3(%arg0: i32, %arg1: i32) -> (i32, i32) {
    %c0_i32 = arith.constant 0 : i32
    %c0_i32_0 = arith.constant 0 : i32
    return %arg0, %c0_i32 : i32, i32
  }
}

module attributes {stable_mosaic.version = 11 : i64} {
  func.func @_downsample_kernel(%arg0: i32, %arg1: i32, %arg2: memref<128x36xf32, #tpu.memory_space<vmem>>, %arg3: memref<36x128xf32, #tpu.memory_space<vmem>>, %arg4: memref<2x128xf32, #tpu.memory_space<vmem>>, %arg5: memref<128x128xf32, #tpu.memory_space<vmem>>) attributes {dimension_semantics = [#tpu.dimension_semantics<parallel>, #tpu.dimension_semantics<arbitrary>], iteration_bounds = array<i64: 1, 1>, scalar_prefetch = 0 : i64, scratch_operands = 0 : i64, tpu.core_type = #tpu.core_type<tc>, window_params = [{transform_indices = @transform_0, window_bounds = array<i64: 128, 36>}, {pipeline_mode = #tpu.pipeline_mode<synchronous>, transform_indices = @transform_1, window_bounds = array<i64: 36, 128>}, {pipeline_mode = #tpu.pipeline_mode<synchronous>, transform_indices = @transform_2, window_bounds = array<i64: 2, 128>}, {transform_indices = @transform_3, window_bounds = array<i64: 128, 128>}]} {
    %c0 = arith.constant 0 : index
    %c0_0 = arith.constant 0 : index
    %0 = vector.load %arg2[%c0, %c0_0] : memref<128x36xf32, #tpu.memory_space<vmem>>, vector<128x36xf32>
    %c0_1 = arith.constant 0 : index
    %c0_2 = arith.constant 0 : index
    %1 = vector.load %arg3[%c0_1, %c0_2] : memref<36x128xf32, #tpu.memory_space<vmem>>, vector<36x128xf32>
    %cst = arith.constant dense<0.000000e+00> : vector<128x128xf32>
    %2 = tpu.matmul %0, %1, %cst {dimension_numbers = #tpu.dot_dimension_numbers<[1], [0], [0], [1], [0, 0, 1, 1], [], []>} : vector<128x36xf32>, vector<36x128xf32>, vector<128x128xf32> -> vector<128x128xf32>
    %3 = tpu.iota {dimensions = array<i32: 1>} : vector<128x128xi32>
    %c8_i32 = arith.constant 8 : i32
    %4 = vector.broadcast %c8_i32 : i32 to vector<128x128xi32>
    %5 = arith.cmpi slt, %3, %4 : vector<128x128xi32>
    %cst_3 = arith.constant 0.000000e+00 : f32
    %6 = vector.broadcast %cst_3 : f32 to vector<128x128xf32>
    %7 = arith.select %5, %2, %6 : vector<128x128xi1>, vector<128x128xf32>
    %cst_4 = arith.constant dense<0.000000e+00> : vector<128xf32>
    %8 = vector.multi_reduction <add>, %7, %cst_4 [1] : vector<128x128xf32> to vector<128xf32>
    %9 = vector.shape_cast %8 : vector<128xf32> to vector<128x1xf32>
    %cst_5 = arith.constant 1.250000e-01 : f32
    %10 = vector.broadcast %cst_5 : f32 to vector<128x1xf32>
    %11 = arith.mulf %9, %10 : vector<128x1xf32>
    %12 = vector.broadcast %11 : vector<128x1xf32> to vector<128x128xf32>
    %13 = arith.subf %2, %12 : vector<128x128xf32>
    %cst_6 = arith.constant 0.000000e+00 : f32
    %14 = vector.broadcast %cst_6 : f32 to vector<128x128xf32>
    %15 = arith.select %5, %13, %14 : vector<128x128xi1>, vector<128x128xf32>
    %16 = arith.mulf %15, %15 : vector<128x128xf32>
    %cst_7 = arith.constant dense<0.000000e+00> : vector<128xf32>
    %17 = vector.multi_reduction <add>, %16, %cst_7 [1] : vector<128x128xf32> to vector<128xf32>
    %18 = vector.shape_cast %17 : vector<128xf32> to vector<128x1xf32>
    %cst_8 = arith.constant 1.250000e-01 : f32
    %19 = vector.broadcast %cst_8 : f32 to vector<128x1xf32>
    %20 = arith.mulf %18, %19 : vector<128x1xf32>
    %cst_9 = arith.constant 9.99999974E-6 : f32
    %21 = vector.broadcast %cst_9 : f32 to vector<128x1xf32>
    %22 = arith.addf %20, %21 : vector<128x1xf32>
    %23 = math.rsqrt %22 : vector<128x1xf32>
    %24 = vector.broadcast %23 : vector<128x1xf32> to vector<128x128xf32>
    %25 = arith.mulf %15, %24 : vector<128x128xf32>
    %c0_10 = arith.constant 0 : index
    %c0_11 = arith.constant 0 : index
    %26 = vector.load %arg4[%c0_10, %c0_11] : memref<2x128xf32, #tpu.memory_space<vmem>>, vector<1x128xf32>
    %27 = vector.broadcast %26 : vector<1x128xf32> to vector<128x128xf32>
    %28 = arith.mulf %25, %27 : vector<128x128xf32>
    %c1 = arith.constant 1 : index
    %c0_12 = arith.constant 0 : index
    %29 = vector.load %arg4[%c1, %c0_12] : memref<2x128xf32, #tpu.memory_space<vmem>>, vector<1x128xf32>
    %30 = vector.broadcast %29 : vector<1x128xf32> to vector<128x128xf32>
    %31 = arith.addf %28, %30 : vector<128x128xf32>
    %c0_13 = arith.constant 0 : index
    %c0_14 = arith.constant 0 : index
    %32 = vector.load %arg5[%c0_13, %c0_14] : memref<128x128xf32, #tpu.memory_space<vmem>>, vector<128x128xf32>
    tpu.vector_store %arg5[%c0_13, %c0_14], %31 {strides = array<i32>} : memref<128x128xf32, #tpu.memory_space<vmem>>, vector<128x128xf32>,
    return
  }
  func.func @transform_0(%arg0: i32, %arg1: i32) -> (i32, i32) {
    %c0_i32 = arith.constant 0 : i32
    return %arg0, %arg1 : i32, i32
  }
  func.func @transform_1(%arg0: i32, %arg1: i32) -> (i32, i32) {
    %c0_i32 = arith.constant 0 : i32
    %c0_i32_0 = arith.constant 0 : i32
    %c0_i32_1 = arith.constant 0 : i32
    return %c0_i32, %c0_i32_0 : i32, i32
  }
  func.func @transform_2(%arg0: i32, %arg1: i32) -> (i32, i32) {
    %c0_i32 = arith.constant 0 : i32
    %c0_i32_0 = arith.constant 0 : i32
    %c0_i32_1 = arith.constant 0 : i32
    return %c0_i32, %c0_i32_0 : i32, i32
  }
  func.func @transform_3(%arg0: i32, %arg1: i32) -> (i32, i32) {
    %c0_i32 = arith.constant 0 : i32
    %c0_i32_0 = arith.constant 0 : i32
    return %arg0, %c0_i32 : i32, i32
  }
}

</mosaic_0001>

<bundles_post_ra>
// kernel: tpu_custom_call.1
= control target key start
LH: loop header
LB: loop body
LE: loop exit
PB: predicated region body
PF: predicated region fallthrough
CT: control target
= control target key end

     0   :  { %vm85_vm0 = vcmask 1043456   ;;  %s1103_s0 = inlined_call_operand.vmem [shape: f32[128,36], index: 0, kind: input, shape index: {}]   ;;  %s1104_s1 = inlined_call_operand.vmem [shape: f32[36,128], index: 1, kind: input, shape index: {}]   ;;  %s1105_s2 = inlined_call_operand.vmem [shape: f32[2,128], index: 2, kind: input, shape index: {}]   ;;  %s1106_s3 = inlined_call_operand.hbm [shape: f32[128,128], index: 3, kind: output, shape index: {}]  }
   0x1   :  { %v35_v0 = vld [vmem:[%s1104_s1 + $0x20] sm:$0xf]  ;;  %v34_v1 = vld [vmem:[%s1104_s1 + $0x18] sm:$0xff]  ;;  %v33_v2 = vld [vmem:[%s1104_s1 + $0x10] sm:$0xff] }
   0x2   :  { %579 = vmatpush.msk.msra.mxu0 %vm85_vm0, %v35_v0  ;;  %596 = vmatpush.msk.msra.mxu1 %vm85_vm0, %v35_v0  ;;  %v32_v3 = vld [vmem:[%s1104_s1 + $0x8] sm:$0xff]  ;;  %v31_v4 = vld [vmem:[%s1104_s1] sm:$0xff] }
   0x3   :  { %597 = vmatpush.msk.msra.mxu2 %vm85_vm0, %v35_v0  ;;  %598 = vmatpush.msk.msra.mxu3 %vm85_vm0, %v35_v0 }
   0x4   :  { %101 = vmatpush.msra.mxu0 %v34_v1  ;;  %599 = vmatpush.msra.mxu1 %v34_v1 }
   0x5   :  { %600 = vmatpush.msra.mxu2 %v34_v1  ;;  %601 = vmatpush.msra.mxu3 %v34_v1 }
   0x6   :  { %102 = vmatpush.msra.mxu0 %v33_v2  ;;  %602 = vmatpush.msra.mxu1 %v33_v2 }
   0x7   :  { %603 = vmatpush.msra.mxu2 %v33_v2  ;;  %604 = vmatpush.msra.mxu3 %v33_v2 }
   0x8   :  { %103 = vmatpush.msra.mxu0 %v32_v3  ;;  %605 = vmatpush.msra.mxu1 %v32_v3 }
   0x9   :  { %8 = vsyncpa [#allocation3], 0  ;;  %606 = vmatpush.msra.mxu2 %v32_v3  ;;  %607 = vmatpush.msra.mxu3 %v32_v3  ;;  %v15_v5 = vld [vmem:[%s1103_s0] sm:$0xff]  ;;  %vm36_vm1 = vcmask 293888   ;;  %v16_v9 = vld [vmem:[%s1103_s0 + $0x8] sm:$0xff]  ;;  %v154_v21 = vlaneseq  ;;  %s567_s4 = sshll.u32 %s1106_s3, 4  ;;  %s568_s4 = int_to_ptr.hbm [resolvable:$true] %s567_s4 }
   0xa   :  { %v19_v6 = vld [vmem:[%s1103_s0 + $0x20] sm:$0xff]  ;;  %104 = vmatpush.msra.mxu0 %v31_v4  ;;  %608 = vmatpush.msra.mxu1 %v31_v4  ;;  %v20_v10 = vld [vmem:[%s1103_s0 + $0x28] sm:$0xff]  ;;  %v17_v13 = vld [vmem:[%s1103_s0 + $0x10] sm:$0xff]  ;;  %s675_s5 = smov 128   ;;  %s676_s6 = smov 8  }
   0xb   :  { %v23_v7 = vld [vmem:[%s1103_s0 + $0x40] sm:$0xff]  ;;  %609 = vmatpush.msra.mxu2 %v31_v4  ;;  %610 = vmatpush.msra.mxu3 %v31_v4  ;;  %v24_v11 = vld [vmem:[%s1103_s0 + $0x48] sm:$0xff]  ;;  %v21_v14 = vld [vmem:[%s1103_s0 + $0x30] sm:$0xff]  ;;  %v776_v22 = vand.u32 127, %v154_v21 }
   0xc   :  { %v27_v8 = vld [vmem:[%s1103_s0 + $0x60] sm:$0xff]  ;;  %580 = vmatmul.msk.f32.vlgmr.msra.gmra.mxu0 %vm36_vm1, %v15_v5  ;;  %584 = vmatmul.msk.f32.vlgmr.msra.gmra.mxu1 %vm36_vm1, %v19_v6  ;;  %v28_v12 = vld [vmem:[%s1103_s0 + $0x68] sm:$0xff]  ;;  %v25_v15 = vld [vmem:[%s1103_s0 + $0x50] sm:$0xff] }
   0xd   :  { %588 = vmatmul.msk.f32.vlgmr.msra.gmra.mxu2 %vm36_vm1, %v23_v7  ;;  %592 = vmatmul.msk.f32.vlgmr.msra.gmra.mxu3 %vm36_vm1, %v27_v8  ;;  %v29_v16 = vld [vmem:[%s1103_s0 + $0x70] sm:$0xff]  ;;  %v18_v17 = vld [vmem:[%s1103_s0 + $0x18] sm:$0xff]  ;;  %vm156_vm2 = vcmp.lt.s32.totalorder %v776_v22, 8 }
   0xe   :  { %v22_v18 = vld [vmem:[%s1103_s0 + $0x38] sm:$0xff] }
   0xf   :  { %v26_v19 = vld [vmem:[%s1103_s0 + $0x58] sm:$0xff] }
  0x10   :  { %v30_v20 = vld [vmem:[%s1103_s0 + $0x78] sm:$0xff] }
  0x14   :  { %581 = vmatmul.msk.f32.gmra.mxu0 %vm36_vm1, %v16_v9  ;;  %585 = vmatmul.msk.f32.gmra.mxu1 %vm36_vm1, %v20_v10 }
  0x15   :  { %589 = vmatmul.msk.f32.gmra.mxu2 %vm36_vm1, %v24_v11  ;;  %593 = vmatmul.msk.f32.gmra.mxu3 %vm36_vm1, %v28_v12 }
  0x1c   :  { %582 = vmatmul.msk.f32.gmra.mxu0 %vm36_vm1, %v17_v13  ;;  %586 = vmatmul.msk.f32.gmra.mxu1 %vm36_vm1, %v21_v14 }
  0x1d   :  { %590 = vmatmul.msk.f32.gmra.mxu2 %vm36_vm1, %v25_v15  ;;  %594 = vmatmul.msk.f32.gmra.mxu3 %vm36_vm1, %v29_v16 }
  0x24   :  { %583 = vmatmul.msk.f32.gmra.mxu0 %vm36_vm1, %v18_v17  ;;  %587 = vmatmul.msk.f32.gmra.mxu1 %vm36_vm1, %v22_v18 }
  0x25   :  { %591 = vmatmul.msk.f32.gmra.mxu2 %vm36_vm1, %v26_v19  ;;  %595 = vmatmul.msk.f32.gmra.mxu3 %vm36_vm1, %v30_v20 }
  0x89   :  { %v106_v23 = vpop.f32.mrf.mxu0  ;;  %v118_v24 = vpop.f32.mrf.mxu1 }
  0x8a   :  { %v161_v25 = vsel %vm156_vm2, %v118_v24, 0.0  ;;  %v157_v26 = vsel %vm156_vm2, %v106_v23, 0.0 }
  0x8b   :  { %181 = vadd.xlane.f32.xlu2 %v161_v25  ;;  %173 = vadd.xlane.f32.xlu0 %v157_v26 }
  0x90   :  { %v130_v27 = vpop.f32.mrf.mxu2  ;;  %v142_v28 = vpop.f32.mrf.mxu3 }
  0x91   :  { %v165_v29 = vsel %vm156_vm2, %v130_v27, 0.0  ;;  %v169_v30 = vsel %vm156_vm2, %v142_v28, 0.0  ;;  %v787_v31 = vpop.f32.mrf.mxu0  ;;  %v789_v32 = vpop.f32.mrf.mxu1 }
  0x92   :  { %v162_v35 = vsel %vm156_vm2, %v789_v32, 0.0  ;;  %v158_v37 = vsel %vm156_vm2, %v787_v31, 0.0 }
  0x93   :  { %189 = vadd.xlane.f32.xlu2 %v165_v29  ;;  %197 = vadd.xlane.f32.xlu0 %v169_v30 }
  0x98   :  { %v791_v33 = vpop.f32.mrf.mxu2  ;;  %v793_v34 = vpop.f32.mrf.mxu3 }
  0x99   :  { %v170_v36 = vsel %vm156_vm2, %v793_v34, 0.0  ;;  %v804_v38 = vpop.f32.mrf.mxu0  ;;  %v166_v41 = vsel %vm156_vm2, %v791_v33, 0.0  ;;  %v816_v43 = vpop.f32.mrf.mxu1 }
  0x9a   :  { %199 = vadd.xlane.f32.xlu1 %v170_v36  ;;  %v159_v39 = vsel %vm156_vm2, %v804_v38, 0.0  ;;  %v163_v46 = vsel %vm156_vm2, %v816_v43, 0.0 }
  0x9b   :  { %183 = vadd.xlane.f32.xlu2 %v162_v35  ;;  %175 = vadd.xlane.f32.xlu0 %v158_v37 }
  0xa0   :  { %v809_v40 = vpop.f32.mrf.mxu2  ;;  %v814_v42 = vpop.f32.mrf.mxu3 }
  0xa1   :  { %v167_v44 = vsel %vm156_vm2, %v809_v40, 0.0  ;;  %v829_v48 = vpop.f32.mrf.mxu0  ;;  %v171_v50 = vsel %vm156_vm2, %v814_v42, 0.0  ;;  %v842_v53 = vpop.f32.mrf.mxu1 }
  0xa2   :  { %177 = vadd.xlane.f32.xlu1 %v159_v39  ;;  %v160_v51 = vsel %vm156_vm2, %v829_v48, 0.0  ;;  %v164_v54 = vsel %vm156_vm2, %v842_v53, 0.0 }
  0xa3   :  { %191 = vadd.xlane.f32.xlu0 %v166_v41 }
  0xa8   :  { %v821_v45 = vpop.f32.mrf.mxu2  ;;  %v831_v49 = vpop.f32.mrf.mxu3 }
  0xa9   :  { %v168_v47 = vsel %vm156_vm2, %v821_v45, 0.0  ;;  %v172_v52 = vsel %vm156_vm2, %v831_v49, 0.0 }
  0xaa   :  { %195 = vadd.xlane.f32.xlu2 %v168_v47  ;;  %193 = vadd.xlane.f32.xlu1 %v167_v44 }
  0xab   :  { %185 = vadd.xlane.f32.xlu0 %v163_v46 }
  0xb2   :  { %201 = vadd.xlane.f32.xlu2 %v171_v50  ;;  %179 = vadd.xlane.f32.xlu1 %v160_v51 }
  0xb3   :  { %203 = vadd.xlane.f32.xlu0 %v172_v52 }
  0xba   :  { %187 = vadd.xlane.f32.xlu1 %v164_v54 }
  0xfe   :  { %v182_v55 = vpop.xlane.xlu2 %181  ;;  %v174_v56 = vpop.xlane.xlu0 %173 }
  0xff   :  { %v209_v57 = vmul.f32 0.125, %v182_v55  ;;  %v205_v58 = vmul.f32 0.125, %v174_v56 }
 0x101   :  { %v225_v59 = vsub.f32 %v118_v24, %v209_v57  ;;  %v221_v60 = vsub.f32 %v106_v23, %v205_v58 }
 0x103   :  { %v849_v61 = vsel %vm156_vm2, %v225_v59, 0.0  ;;  %v853_v62 = vsel %vm156_vm2, %v221_v60, 0.0 }
 0x104   :  { %v257_v63 = vmul.f32 %v849_v61, %v849_v61  ;;  %v253_v0 = vmul.f32 %v853_v62, %v853_v62 }
 0x106   :  { %v190_v1 = vpop.xlane.xlu2 %189  ;;  %277 = vadd.xlane.f32.xlu2 %v257_v63  ;;  %v198_v2 = vpop.xlane.xlu0 %197  ;;  %269 = vadd.xlane.f32.xlu1 %v253_v0 }
 0x107   :  { %v213_v3 = vmul.f32 0.125, %v190_v1  ;;  %v217_v4 = vmul.f32 0.125, %v198_v2 }
 0x109   :  { %v229_v5 = vsub.f32 %v130_v27, %v213_v3  ;;  %v233_v6 = vsub.f32 %v142_v28, %v217_v4 }
 0x10b   :  { %v861_v7 = vsel %vm156_vm2, %v229_v5, 0.0  ;;  %v865_v8 = vsel %vm156_vm2, %v233_v6, 0.0 }
 0x10c   :  { %v261_v9 = vmul.f32 %v861_v7, %v861_v7  ;;  %v265_v10 = vmul.f32 %v865_v8, %v865_v8 }
 0x10d   :  { %v200_v11 = vpop.xlane.xlu1 %199 }
 0x10e   :  { %v184_v12 = vpop.xlane.xlu2 %183  ;;  %285 = vadd.xlane.f32.xlu0 %v261_v9  ;;  %v176_v13 = vpop.xlane.xlu0 %175  ;;  %293 = vadd.xlane.f32.xlu1 %v265_v10 }
 0x10f   :  { %v210_v14 = vmul.f32 0.125, %v184_v12  ;;  %v206_v15 = vmul.f32 0.125, %v176_v13 }
 0x111   :  { %v226_v16 = vsub.f32 %v789_v32, %v210_v14  ;;  %v222_v17 = vsub.f32 %v787_v31, %v206_v15 }
 0x113   :  { %v875_v18 = vsel %vm156_vm2, %v226_v16, 0.0  ;;  %v879_v19 = vsel %vm156_vm2, %v222_v17, 0.0 }
 0x114   :  { %v258_v20 = vmul.f32 %v875_v18, %v875_v18  ;;  %v254_v21 = vmul.f32 %v879_v19, %v879_v19 }
 0x115   :  { %v178_v23 = vpop.xlane.xlu1 %177 }
 0x116   :  { %v207_v24 = vmul.f32 0.125, %v178_v23  ;;  %279 = vadd.xlane.f32.xlu0 %v258_v20  ;;  %271 = vadd.xlane.f32.xlu2 %v254_v21  ;;  %v192_v25 = vpop.xlane.xlu0 %191 }
 0x117   :  { %v214_v26 = vmul.f32 0.125, %v192_v25 }
 0x118   :  { %v223_v27 = vsub.f32 %v804_v38, %v207_v24 }
 0x119   :  { %v230_v28 = vsub.f32 %v791_v33, %v214_v26 }
 0x11a   :  { %v889_v29 = vsel %vm156_vm2, %v223_v27, 0.0 }
 0x11b   :  { %v893_v30 = vsel %vm156_vm2, %v230_v28, 0.0  ;;  %v255_v31 = vmul.f32 %v889_v29, %v889_v29 }
 0x11c   :  { %v262_v32 = vmul.f32 %v893_v30, %v893_v30 }
 0x11d   :  { %v196_v35 = vpop.xlane.xlu2 %195  ;;  %v194_v36 = vpop.xlane.xlu1 %193 }
 0x11e   :  { %v216_v37 = vmul.f32 0.125, %v196_v35  ;;  %v215_v38 = vmul.f32 0.125, %v194_v36  ;;  %v186_v39 = vpop.xlane.xlu0 %185  ;;  %273 = vadd.xlane.f32.xlu0 %v255_v31  ;;  %287 = vadd.xlane.f32.xlu1 %v262_v32 }
 0x11f   :  { %v211_v33 = vmul.f32 0.125, %v186_v39 }
 0x120   :  { %v232_v41 = vsub.f32 %v821_v45, %v216_v37  ;;  %v231_v44 = vsub.f32 %v809_v40, %v215_v38 }
 0x121   :  { %v227_v46 = vsub.f32 %v816_v43, %v211_v33 }
 0x122   :  { %v904_v47 = vsel %vm156_vm2, %v231_v44, 0.0  ;;  %v908_v50 = vsel %vm156_vm2, %v232_v41, 0.0 }
 0x123   :  { %v263_v51 = vmul.f32 %v904_v47, %v904_v47  ;;  %v914_v52 = vsel %vm156_vm2, %v227_v46, 0.0  ;;  %v264_v40 = vmul.f32 %v908_v50, %v908_v50 }
 0x124   :  { %v259_v43 = vmul.f32 %v914_v52, %v914_v52 }
 0x125   :  { %v202_v45 = vpop.xlane.xlu2 %201  ;;  %289 = vadd.xlane.f32.xlu2 %v263_v51  ;;  %v180_v54 = vpop.xlane.xlu1 %179 }
 0x126   :  { %v219_v55 = vmul.f32 0.125, %v202_v45  ;;  %v208_v56 = vmul.f32 0.125, %v180_v54  ;;  %v204_v57 = vpop.xlane.xlu0 %203  ;;  %291 = vadd.xlane.f32.xlu0 %v264_v40  ;;  %281 = vadd.xlane.f32.xlu1 %v259_v43 }
 0x127   :  { %v220_v60 = vmul.f32 0.125, %v204_v57 }
 0x128   :  { %v235_v58 = vsub.f32 %v814_v42, %v219_v55  ;;  %v224_v59 = vsub.f32 %v829_v48, %v208_v56  ;;  %v218_v48 = vmul.f32 0.125, %v200_v11  ;;  %v969_v56 = vld [vmem:[%s1105_s2] ss:$0 sm:$0xff] }
 0x129   :  { %v236_v3 = vsub.f32 %v831_v49, %v220_v60 }
 0x12a   :  { %v924_v63 = vsel %vm156_vm2, %v235_v58, 0.0  ;;  %v928_v0 = vsel %vm156_vm2, %v224_v59, 0.0  ;;  %v234_v49 = vsub.f32 %v793_v34, %v218_v48 }
 0x12b   :  { %v267_v1 = vmul.f32 %v924_v63, %v924_v63  ;;  %v256_v2 = vmul.f32 %v928_v0, %v928_v0  ;;  %v938_v6 = vsel %vm156_vm2, %v236_v3, 0.0 }
 0x12c   :  { %v268_v12 = vmul.f32 %v938_v6, %v938_v6 }
 0x12d   :  { %v188_v42 = vpop.xlane.xlu1 %187 }
 0x12e   :  { %v212_v4 = vmul.f32 0.125, %v188_v42  ;;  %297 = vadd.xlane.f32.xlu0 %v267_v1  ;;  %275 = vadd.xlane.f32.xlu1 %v256_v2  ;;  %v977_v1 = vld [vmem:[%s1105_s2 + $0x1] ss:$0 sm:$0xff]  ;;  %s674_s2 = smov [#allocation2]  }
 0x12f   :  { %s565_s28 = sshll.u32 %s674_s2, 4  ;;  %s566_s28 = int_to_ptr.vmem [resolvable:$true] %s565_s28 }
 0x130   :  { %v228_v5 = vsub.f32 %v842_v53, %v212_v4  ;;  %v951_v53 = vsel %vm156_vm2, %v234_v49, 0.0 }
 0x131   :  { %v266_v11 = vmul.f32 %v951_v53, %v951_v53 }
 0x132   :  { %v942_v9 = vsel %vm156_vm2, %v228_v5, 0.0 }
 0x133   :  { %v260_v10 = vmul.f32 %v942_v9, %v942_v9 }
 0x135   :  { %283 = vadd.xlane.f32.xlu2 %v260_v10 }
 0x136   :  { %299 = vadd.xlane.f32.xlu1 %v268_v12 }
 0x13d   :  { %295 = vadd.xlane.f32.xlu2 %v266_v11 }
 0x179   :  { %v278_v13 = vpop.xlane.xlu2 %277  ;;  %v270_v14 = vpop.xlane.xlu1 %269 }
 0x17a   :  { %v305_v15 = vmul.f32 0.125, %v278_v13  ;;  %v301_v16 = vmul.f32 0.125, %v270_v14 }
 0x17c   :  { %v321_v17 = vadd.f32 1e-05, %v305_v15  ;;  %v317_v20 = vadd.f32 1e-05, %v301_v16 }
 0x17e   :  { %616 = vrsqrt.f32 %v321_v17  ;;  %vm379_vm5 = vweird.f32 %v321_v17  ;;  %vm339_vm7 = vweird.f32 %v317_v20 }
 0x17f   :  { %618 = vrsqrt.f32 %v317_v20 }
 0x181   :  { %v286_v34 = vpop.xlane.xlu0 %285  ;;  %v294_v21 = vpop.xlane.xlu1 %293 }
 0x182   :  { %v309_v23 = vmul.f32 0.125, %v286_v34  ;;  %v313_v24 = vmul.f32 0.125, %v294_v21 }
 0x184   :  { %v617_v25 = vpop.eup %616  ;;  %v955_v22 = vadd.f32 1e-05, %v309_v23  ;;  %v957_v26 = vadd.f32 1e-05, %v313_v24 }
 0x185   :  { %v619_v27 = vpop.eup %618  ;;  %v374_v28 = vmul.f32 %v617_v25, %v321_v17  ;;  %vm380_vm3 = vweird.f32 %v617_v25 }
 0x186   :  { %v334_v31 = vmul.f32 %v619_v27, %v317_v20  ;;  %620 = vrsqrt.f32 %v955_v22  ;;  %vm340_vm4 = vweird.f32 %v619_v27  ;;  %vm381_vm6 = vmor %vm379_vm5, %vm380_vm3  ;;  %vm419_vm11 = vweird.f32 %v955_v22 }
 0x187   :  { %v375_v32 = vmul.f32 %v617_v25, %v374_v28  ;;  %622 = vrsqrt.f32 %v957_v26  ;;  %vm341_vm8 = vmor %vm339_vm7, %vm340_vm4  ;;  %vm459_vm13 = vweird.f32 %v957_v26 }
 0x188   :  { %v335_v35 = vmul.f32 %v619_v27, %v334_v31 }
 0x189   :  { %v376_v36 = vmul.f32 0.5, %v375_v32  ;;  %v272_v37 = vpop.xlane.xlu2 %271  ;;  %v280_v38 = vpop.xlane.xlu0 %279 }
 0x18a   :  { %v336_v39 = vmul.f32 0.5, %v335_v35  ;;  %v302_v33 = vmul.f32 0.125, %v272_v37  ;;  %v306_v41 = vmul.f32 0.125, %v280_v38 }
 0x18b   :  { %v377_v44 = vsub.f32 1.5, %v376_v36 }
 0x18c   :  { %v621_v46 = vpop.eup %620  ;;  %v337_v51 = vsub.f32 1.5, %v336_v39  ;;  %v961_v40 = vadd.f32 1e-05, %v302_v33  ;;  %v963_v43 = vadd.f32 1e-05, %v306_v41 }
 0x18d   :  { %v623_v45 = vpop.eup %622  ;;  %v378_v54 = vmul.f32 %v617_v25, %v377_v44  ;;  %v414_v55 = vmul.f32 %v621_v46, %v955_v22  ;;  %vm420_vm9 = vweird.f32 %v621_v46 }
 0x18e   :  { %v338_v57 = vmul.f32 %v619_v27, %v337_v51  ;;  %v454_v58 = vmul.f32 %v623_v45, %v957_v26  ;;  %624 = vrsqrt.f32 %v961_v40  ;;  %vm460_vm10 = vweird.f32 %v623_v45  ;;  %vm421_vm12 = vmor %vm419_vm11, %vm420_vm9 }
 0x18f   :  { %v382_v59 = vsel %vm381_vm6, %v617_v25, %v378_v54  ;;  %v415_v60 = vmul.f32 %v621_v46, %v414_v55  ;;  %626 = vrsqrt.f32 %v963_v43  ;;  %vm461_vm14 = vmor %vm459_vm13, %vm460_vm10  ;;  %vm349_vm15 = vweird.f32 %v961_v40 }
 0x190   :  { %v497_v2 = vmul.f32 %v382_v59, %v849_v61  ;;  %v342_v3 = vsel %vm341_vm8, %v619_v27, %v338_v57  ;;  %v455_v42 = vmul.f32 %v623_v45, %v454_v58  ;;  %vm389_vm3 = vweird.f32 %v963_v43 }
 0x191   :  { %v493_v4 = vmul.f32 %v342_v3, %v853_v62  ;;  %v416_v48 = vmul.f32 0.5, %v415_v60  ;;  %v274_v5 = vpop.xlane.xlu0 %273  ;;  %v288_v10 = vpop.xlane.xlu1 %287 }
 0x192   :  { %v515_v49 = vmul.f32 %v969_v56, %v497_v2  ;;  %v456_v12 = vmul.f32 0.5, %v455_v42  ;;  %v303_v11 = vmul.f32 0.125, %v274_v5  ;;  %v310_v13 = vmul.f32 0.125, %v288_v10 }
 0x193   :  { %v511_v14 = vmul.f32 %v969_v56, %v493_v4  ;;  %v417_v15 = vsub.f32 1.5, %v416_v48 }
 0x194   :  { %v625_v16 = vpop.eup %624  ;;  %v533_v61 = vadd.f32 %v977_v1, %v515_v49  ;;  %v457_v17 = vsub.f32 1.5, %v456_v12  ;;  %v984_v20 = vadd.f32 1e-05, %v303_v11  ;;  %v986_v62 = vadd.f32 1e-05, %v310_v13 }
 0x195   :  { %v627_v34 = vpop.eup %626  ;;  %v529_v21 = vadd.f32 %v977_v1, %v511_v14  ;;  %v418_v23 = vmul.f32 %v621_v46, %v417_v15  ;;  %v344_v24 = vmul.f32 %v625_v16, %v961_v40  ;;  %vm350_vm0 = vweird.f32 %v625_v16 }
 0x196   :  { %549 = vst [vmem:[#allocation2 + $0x20] sm:$0xff] %v533_v61  ;;  %v458_v25 = vmul.f32 %v623_v45, %v457_v17  ;;  %v384_v27 = vmul.f32 %v627_v34, %v963_v43  ;;  %628 = vrsqrt.f32 %v984_v20  ;;  %vm390_vm1 = vweird.f32 %v627_v34  ;;  %vm351_vm2 = vmor %vm349_vm15, %vm350_vm0 }
 0x197   :  { %545 = vst [vmem:[#allocation2] sm:$0xff] %v529_v21  ;;  %v422_v28 = vsel %vm421_vm12, %v621_v46, %v418_v23  ;;  %v345_v31 = vmul.f32 %v625_v16, %v344_v24  ;;  %630 = vrsqrt.f32 %v986_v62  ;;  %vm391_vm4 = vmor %vm389_vm3, %vm390_vm1  ;;  %vm359_vm7 = vweird.f32 %v984_v20 }
 0x198   :  { %v501_v22 = vmul.f32 %v422_v28, %v861_v7  ;;  %v462_v32 = vsel %vm461_vm14, %v623_v45, %v458_v25  ;;  %v385_v35 = vmul.f32 %v627_v34, %v384_v27  ;;  %v290_v36 = vpop.xlane.xlu2 %289  ;;  %vm429_vm9 = vweird.f32 %v986_v62 }
 0x199   :  { %v505_v37 = vmul.f32 %v462_v32, %v865_v8  ;;  %v346_v38 = vmul.f32 0.5, %v345_v31  ;;  %v311_v26 = vmul.f32 0.125, %v290_v36  ;;  %v292_v39 = vpop.xlane.xlu0 %291  ;;  %v282_v33 = vpop.xlane.xlu1 %281 }
 0x19a   :  { %v519_v41 = vmul.f32 %v969_v56, %v501_v22  ;;  %v386_v44 = vmul.f32 0.5, %v385_v35  ;;  %v312_v46 = vmul.f32 0.125, %v292_v39  ;;  %v307_v51 = vmul.f32 0.125, %v282_v33 }
 0x19b   :  { %v523_v54 = vmul.f32 %v969_v56, %v505_v37  ;;  %v347_v55 = vsub.f32 1.5, %v346_v38  ;;  %v1001_v7 = vadd.f32 1e-05, %v311_v26 }
 0x19c   :  { %v629_v45 = vpop.eup %628  ;;  %v537_v8 = vadd.f32 %v977_v1, %v519_v41  ;;  %v387_v57 = vsub.f32 1.5, %v386_v44  ;;  %v1004_v58 = vadd.f32 1e-05, %v312_v46  ;;  %v1008_v42 = vadd.f32 1e-05, %v307_v51 }
 0x19d   :  { %v631_v59 = vpop.eup %630  ;;  %v541_v60 = vadd.f32 %v977_v1, %v523_v54  ;;  %v348_v2 = vmul.f32 %v625_v16, %v347_v55  ;;  %v354_v3 = vmul.f32 %v629_v45, %v984_v20  ;;  %632 = vrsqrt.f32 %v1001_v7 }
 0x19e   :  { %553 = vst [vmem:[#allocation2 + $0x40] sm:$0xff] %v537_v8  ;;  %v388_v4 = vmul.f32 %v627_v34, %v387_v57  ;;  %v424_v48 = vmul.f32 %v631_v59, %v986_v62  ;;  %634 = vrsqrt.f32 %v1004_v58  ;;  %vm360_vm5 = vweird.f32 %v629_v45 }
 0x19f   :  { %557 = vst [vmem:[#allocation2 + $0x60] sm:$0xff] %v541_v60  ;;  %v352_v5 = vsel %vm351_vm2, %v625_v16, %v348_v2  ;;  %v355_v10 = vmul.f32 %v629_v45, %v354_v3  ;;  %636 = vrsqrt.f32 %v1008_v42  ;;  %vm430_vm6 = vweird.f32 %v631_v59  ;;  %vm361_vm8 = vmor %vm359_vm7, %vm360_vm5 }
 0x1a0   :  { %v494_v49 = vmul.f32 %v352_v5, %v879_v19  ;;  %v392_v12 = vsel %vm391_vm4, %v627_v34, %v388_v4  ;;  %v425_v11 = vmul.f32 %v631_v59, %v424_v48  ;;  %vm431_vm10 = vmor %vm429_vm9, %vm430_vm6  ;;  %vm439_vm11 = vweird.f32 %v1001_v7 }
 0x1a1   :  { %v498_v40 = vmul.f32 %v392_v12, %v875_v18  ;;  %v356_v13 = vmul.f32 0.5, %v355_v10  ;;  %v298_v43 = vpop.xlane.xlu0 %297  ;;  %v276_v14 = vpop.xlane.xlu1 %275  ;;  %vm449_vm12 = vweird.f32 %v1004_v58  ;;  %vm399_vm2 = vweird.f32 %v1008_v42 }
 0x1a2   :  { %v512_v15 = vmul.f32 %v969_v56, %v494_v49  ;;  %v426_v61 = vmul.f32 0.5, %v425_v11  ;;  %v315_v16 = vmul.f32 0.125, %v298_v43  ;;  %v304_v17 = vmul.f32 0.125, %v276_v14 }
 0x1a3   :  { %v516_v21 = vmul.f32 %v969_v56, %v498_v40  ;;  %v357_v23 = vsub.f32 1.5, %v356_v13  ;;  %v1022_v19 = vpop.eup %632 }
 0x1a4   :  { %v530_v34 = vadd.f32 %v977_v1, %v512_v15  ;;  %v427_v18 = vsub.f32 1.5, %v426_v61  ;;  %v1025_v24 = vadd.f32 1e-05, %v315_v16  ;;  %v1027_v25 = vadd.f32 1e-05, %v304_v17  ;;  %v1029_v27 = vpop.eup %634 }
 0x1a5   :  { %v534_v28 = vadd.f32 %v977_v1, %v516_v21  ;;  %v358_v31 = vmul.f32 %v629_v45, %v357_v23  ;;  %v434_v22 = vmul.f32 %v1022_v19, %v1001_v7  ;;  %v444_v35 = vmul.f32 %v1029_v27, %v1004_v58  ;;  %v637_v36 = vpop.eup %636 }
 0x1a6   :  { %546 = vst [vmem:[#allocation2 + $0x8] sm:$0xff] %v530_v34  ;;  %v428_v32 = vmul.f32 %v631_v59, %v427_v18  ;;  %638 = vrsqrt.f32 %v1025_v24  ;;  %v394_v62 = vmul.f32 %v637_v36, %v1008_v42  ;;  %vm440_vm13 = vweird.f32 %v1022_v19 }
 0x1a7   :  { %550 = vst [vmem:[#allocation2 + $0x28] sm:$0xff] %v534_v28  ;;  %v362_v37 = vsel %vm361_vm8, %v629_v45, %v358_v31  ;;  %v435_v20 = vmul.f32 %v1022_v19, %v434_v22  ;;  %640 = vrsqrt.f32 %v1027_v25  ;;  %v445_v39 = vmul.f32 %v1029_v27, %v444_v35  ;;  %vm441_vm15 = vmor %vm439_vm11, %vm440_vm13 }
 0x1a8   :  { %v495_v38 = vmul.f32 %v362_v37, %v889_v29  ;;  %v432_v26 = vsel %vm431_vm10, %v631_v59, %v428_v32  ;;  %v284_v33 = vpop.xlane.xlu2 %283  ;;  %v395_v54 = vmul.f32 %v637_v36, %v394_v62  ;;  %vm450_vm14 = vweird.f32 %v1029_v27 }
 0x1a9   :  { %v502_v41 = vmul.f32 %v432_v26, %v893_v30  ;;  %v436_v44 = vmul.f32 0.5, %v435_v20  ;;  %v446_v51 = vmul.f32 0.5, %v445_v39  ;;  %v308_v55 = vmul.f32 0.125, %v284_v33  ;;  %v300_v45 = vpop.xlane.xlu1 %299  ;;  %vm451_vm1 = vmor %vm449_vm12, %vm450_vm14 }
 0x1aa   :  { %v513_v46 = vmul.f32 %v969_v56, %v495_v38  ;;  %v396_v60 = vmul.f32 0.5, %v395_v54  ;;  %v316_v10 = vmul.f32 0.125, %v300_v45  ;;  %vm400_vm0 = vweird.f32 %v637_v36 }
 0x1ab   :  { %v520_v29 = vmul.f32 %v969_v56, %v502_v41  ;;  %v437_v8 = vsub.f32 1.5, %v436_v44  ;;  %v447_v59 = vsub.f32 1.5, %v446_v51  ;;  %v1053_v2 = vadd.f32 1e-05, %v308_v55  ;;  %vm401_vm3 = vmor %vm399_vm2, %vm400_vm0 }
 0x1ac   :  { %v639_v57 = vpop.eup %638  ;;  %v531_v30 = vadd.f32 %v977_v1, %v513_v46  ;;  %v397_v12 = vsub.f32 1.5, %v396_v60  ;;  %v332_v21 = vadd.f32 1e-05, %v316_v10  ;;  %vm479_vm6 = vweird.f32 %v1025_v24 }
 0x1ad   :  { %v641_v3 = vpop.eup %640  ;;  %v538_v4 = vadd.f32 %v977_v1, %v520_v29  ;;  %v438_v48 = vmul.f32 %v1022_v19, %v437_v8  ;;  %v474_v5 = vmul.f32 %v639_v57, %v1025_v24  ;;  %v448_v49 = vmul.f32 %v1029_v27, %v447_v59 }
 0x1ae   :  { %547 = vst [vmem:[#allocation2 + $0x10] sm:$0xff] %v531_v30  ;;  %v364_v11 = vmul.f32 %v641_v3, %v1027_v25  ;;  %642 = vrsqrt.f32 %v1053_v2  ;;  %v398_v14 = vmul.f32 %v637_v36, %v397_v12  ;;  %vm480_vm4 = vweird.f32 %v639_v57 }
 0x1af   :  { %554 = vst [vmem:[#allocation2 + $0x48] sm:$0xff] %v538_v4  ;;  %v442_v40 = vsel %vm441_vm15, %v1022_v19, %v438_v48  ;;  %v475_v13 = vmul.f32 %v639_v57, %v474_v5  ;;  %v452_v43 = vsel %vm451_vm1, %v1029_v27, %v448_v49  ;;  %644 = vrsqrt.f32 %v332_v21  ;;  %vm481_vm7 = vmor %vm479_vm6, %vm480_vm4 }
 0x1b0   :  { %v503_v7 = vmul.f32 %v442_v40, %v904_v47  ;;  %v365_v15 = vmul.f32 %v641_v3, %v364_v11  ;;  %v296_v61 = vpop.xlane.xlu2 %295  ;;  %v504_v16 = vmul.f32 %v452_v43, %v908_v50  ;;  %v402_v19 = vsel %vm401_vm3, %v637_v36, %v398_v14 }
 0x1b1   :  { %v476_v17 = vmul.f32 0.5, %v475_v13  ;;  %v314_v23 = vmul.f32 0.125, %v296_v61  ;;  %v499_v47 = vmul.f32 %v402_v19, %v914_v52  ;;  %vm370_vm5 = vweird.f32 %v641_v3 }
 0x1b2   :  { %v521_v58 = vmul.f32 %v969_v56, %v503_v7  ;;  %v366_v42 = vmul.f32 0.5, %v365_v15  ;;  %v522_v34 = vmul.f32 %v969_v56, %v504_v16  ;;  %vm369_vm8 = vweird.f32 %v1027_v25 }
 0x1b3   :  { %v477_v18 = vsub.f32 1.5, %v476_v17  ;;  %v330_v50 = vadd.f32 1e-05, %v314_v23  ;;  %v517_v32 = vmul.f32 %v969_v56, %v499_v47  ;;  %vm371_vm9 = vmor %vm369_vm8, %vm370_vm5  ;;  %vm409_vm11 = vweird.f32 %v1053_v2 }
 0x1b4   :  { %v539_v27 = vadd.f32 %v977_v1, %v521_v58  ;;  %v367_v28 = vsub.f32 1.5, %v366_v42  ;;  %v643_v31 = vpop.eup %642  ;;  %v540_v22 = vadd.f32 %v977_v1, %v522_v34  ;;  %vm489_vm14 = vweird.f32 %v332_v21 }
 0x1b5   :  { %v478_v35 = vmul.f32 %v639_v57, %v477_v18  ;;  %v404_v52 = vmul.f32 %v643_v31, %v1053_v2  ;;  %646 = vrsqrt.f32 %v330_v50  ;;  %v535_v37 = vadd.f32 %v977_v1, %v517_v32  ;;  %v645_v24 = vpop.eup %644 }
 0x1b6   :  { %555 = vst [vmem:[#allocation2 + $0x50] sm:$0xff] %v539_v27  ;;  %v368_v36 = vmul.f32 %v641_v3, %v367_v28  ;;  %v484_v41 = vmul.f32 %v645_v24, %v332_v21  ;;  %vm410_vm10 = vweird.f32 %v643_v31  ;;  %vm490_vm13 = vweird.f32 %v645_v24 }
 0x1b7   :  { %556 = vst [vmem:[#allocation2 + $0x58] sm:$0xff] %v540_v22  ;;  %v482_v20 = vsel %vm481_vm7, %v639_v57, %v478_v35  ;;  %v405_v39 = vmul.f32 %v643_v31, %v404_v52  ;;  %vm411_vm12 = vmor %vm409_vm11, %vm410_vm10  ;;  %vm469_vm1 = vweird.f32 %v330_v50 }
 0x1b8   :  { %v507_v38 = vmul.f32 %v482_v20, %v924_v63  ;;  %v372_v26 = vsel %vm371_vm9, %v641_v3, %v368_v36  ;;  %551 = vst [vmem:[#allocation2 + $0x30] sm:$0xff] %v535_v37  ;;  %v485_v55 = vmul.f32 %v645_v24, %v484_v41  ;;  %vm491_vm15 = vmor %vm489_vm14, %vm490_vm13 }
 0x1b9   :  { %v496_v62 = vmul.f32 %v372_v26, %v928_v0  ;;  %v406_v25 = vmul.f32 0.5, %v405_v39 }
 0x1ba   :  { %v525_v33 = vmul.f32 %v969_v56, %v507_v38  ;;  %v486_v0 = vmul.f32 0.5, %v485_v55 }
 0x1bb   :  { %v514_v44 = vmul.f32 %v969_v56, %v496_v62  ;;  %v647_v46 = vpop.eup %646  ;;  %v407_v54 = vsub.f32 1.5, %v406_v25 }
 0x1bc   :  { %v543_v51 = vadd.f32 %v977_v1, %v525_v33  ;;  %v464_v45 = vmul.f32 %v647_v46, %v330_v50  ;;  %v487_v30 = vsub.f32 1.5, %v486_v0  ;;  %vm470_vm0 = vweird.f32 %v647_v46 }
 0x1bd   :  { %v532_v63 = vadd.f32 %v977_v1, %v514_v44  ;;  %v408_v29 = vmul.f32 %v643_v31, %v407_v54  ;;  %vm471_vm2 = vmor %vm469_vm1, %vm470_vm0 }
 0x1be   :  { %559 = vst [vmem:[#allocation2 + $0x70] sm:$0xff] %v543_v51  ;;  %v465_v8 = vmul.f32 %v647_v46, %v464_v45  ;;  %v488_v3 = vmul.f32 %v645_v24, %v487_v30 }
 0x1bf   :  { %548 = vst [vmem:[#allocation2 + $0x18] sm:$0xff] %v532_v63  ;;  %v412_v57 = vsel %vm411_vm12, %v643_v31, %v408_v29 }
 0x1c0   :  { %v500_v59 = vmul.f32 %v412_v57, %v942_v9  ;;  %v466_v60 = vmul.f32 0.5, %v465_v8  ;;  %v492_v5 = vsel %vm491_vm15, %v645_v24, %v488_v3 }
 0x1c1   :  { %v508_v10 = vmul.f32 %v492_v5, %v938_v6 }
 0x1c2   :  { %v518_v4 = vmul.f32 %v969_v56, %v500_v59  ;;  %v467_v48 = vsub.f32 1.5, %v466_v60 }
 0x1c3   :  { %v526_v12 = vmul.f32 %v969_v56, %v508_v10 }
 0x1c4   :  { %v536_v2 = vadd.f32 %v977_v1, %v518_v4  ;;  %v468_v49 = vmul.f32 %v647_v46, %v467_v48 }
 0x1c5   :  { %v544_v40 = vadd.f32 %v977_v1, %v526_v12 }
 0x1c6   :  { %552 = vst [vmem:[#allocation2 + $0x38] sm:$0xff] %v536_v2  ;;  %v472_v9 = vsel %vm471_vm2, %v647_v46, %v468_v49 }
 0x1c7   :  { %v506_v11 = vmul.f32 %v472_v9, %v951_v53  ;;  %560 = vst [vmem:[#allocation2 + $0x78] sm:$0xff] %v544_v40 }
 0x1c9   :  { %v524_v13 = vmul.f32 %v969_v56, %v506_v11 }
 0x1cb   :  { %v542_v6 = vadd.f32 %v977_v1, %v524_v13 }
 0x1cd   :  { %558 = vst [vmem:[#allocation2 + $0x68] sm:$0xff] %v542_v6 }
 0x1ce   :  { %573 = dma.vmem_to_hbm [thread:$0]  %s566_s28, 2048, %s568_s4, [#allocation3], %s675_s5, %s675_s5, %s676_s6  }
 0x1cf   :  { %672 = dma.done.wait [#allocation3], 2048  }
 0x1d0   :  { %673 = vsyncadd [#allocation3], 4294965248 }
 0x1d1   :  { %578 = vsyncpa [#allocation3], 1 }

// kernel: tpu_custom_call.1
= control target key start
LH: loop header
LB: loop body
LE: loop exit
PB: predicated region body
PF: predicated region fallthrough
CT: control target
= control target key end

     0   :  { %vm85_vm0 = vcmask 1043456   ;;  %s1103_s0 = inlined_call_operand.vmem [shape: f32[128,36], index: 0, kind: input, shape index: {}]   ;;  %s1104_s1 = inlined_call_operand.vmem [shape: f32[36,128], index: 1, kind: input, shape index: {}]   ;;  %s1105_s2 = inlined_call_operand.vmem [shape: f32[2,128], index: 2, kind: input, shape index: {}]   ;;  %s1106_s3 = inlined_call_operand.hbm [shape: f32[128,128], index: 3, kind: output, shape index: {}]  }
   0x1   :  { %v35_v0 = vld [vmem:[%s1104_s1 + $0x20] sm:$0xf]  ;;  %v34_v1 = vld [vmem:[%s1104_s1 + $0x18] sm:$0xff]  ;;  %v33_v2 = vld [vmem:[%s1104_s1 + $0x10] sm:$0xff] }
   0x2   :  { %579 = vmatpush.msk.msra.mxu0 %vm85_vm0, %v35_v0  ;;  %596 = vmatpush.msk.msra.mxu1 %vm85_vm0, %v35_v0  ;;  %v32_v3 = vld [vmem:[%s1104_s1 + $0x8] sm:$0xff]  ;;  %v31_v4 = vld [vmem:[%s1104_s1] sm:$0xff] }
   0x3   :  { %597 = vmatpush.msk.msra.mxu2 %vm85_vm0, %v35_v0  ;;  %598 = vmatpush.msk.msra.mxu3 %vm85_vm0, %v35_v0 }
   0x4   :  { %101 = vmatpush.msra.mxu0 %v34_v1  ;;  %599 = vmatpush.msra.mxu1 %v34_v1 }
   0x5   :  { %600 = vmatpush.msra.mxu2 %v34_v1  ;;  %601 = vmatpush.msra.mxu3 %v34_v1 }
   0x6   :  { %102 = vmatpush.msra.mxu0 %v33_v2  ;;  %602 = vmatpush.msra.mxu1 %v33_v2 }
   0x7   :  { %603 = vmatpush.msra.mxu2 %v33_v2  ;;  %604 = vmatpush.msra.mxu3 %v33_v2 }
   0x8   :  { %103 = vmatpush.msra.mxu0 %v32_v3  ;;  %605 = vmatpush.msra.mxu1 %v32_v3 }
   0x9   :  { %8 = vsyncpa [#allocation3], 0  ;;  %606 = vmatpush.msra.mxu2 %v32_v3  ;;  %607 = vmatpush.msra.mxu3 %v32_v3  ;;  %v15_v5 = vld [vmem:[%s1103_s0] sm:$0xff]  ;;  %vm36_vm1 = vcmask 293888   ;;  %v16_v9 = vld [vmem:[%s1103_s0 + $0x8] sm:$0xff]  ;;  %v154_v21 = vlaneseq  ;;  %s567_s4 = sshll.u32 %s1106_s3, 4  ;;  %s568_s4 = int_to_ptr.hbm [resolvable:$true] %s567_s4 }
   0xa   :  { %v19_v6 = vld [vmem:[%s1103_s0 + $0x20] sm:$0xff]  ;;  %104 = vmatpush.msra.mxu0 %v31_v4  ;;  %608 = vmatpush.msra.mxu1 %v31_v4  ;;  %v20_v10 = vld [vmem:[%s1103_s0 + $0x28] sm:$0xff]  ;;  %v17_v13 = vld [vmem:[%s1103_s0 + $0x10] sm:$0xff]  ;;  %s675_s5 = smov 128   ;;  %s676_s6 = smov 8  }
   0xb   :  { %v23_v7 = vld [vmem:[%s1103_s0 + $0x40] sm:$0xff]  ;;  %609 = vmatpush.msra.mxu2 %v31_v4  ;;  %610 = vmatpush.msra.mxu3 %v31_v4  ;;  %v24_v11 = vld [vmem:[%s1103_s0 + $0x48] sm:$0xff]  ;;  %v21_v14 = vld [vmem:[%s1103_s0 + $0x30] sm:$0xff]  ;;  %v776_v22 = vand.u32 127, %v154_v21 }
   0xc   :  { %v27_v8 = vld [vmem:[%s1103_s0 + $0x60] sm:$0xff]  ;;  %580 = vmatmul.msk.f32.vlgmr.msra.gmra.mxu0 %vm36_vm1, %v15_v5  ;;  %584 = vmatmul.msk.f32.vlgmr.msra.gmra.mxu1 %vm36_vm1, %v19_v6  ;;  %v28_v12 = vld [vmem:[%s1103_s0 + $0x68] sm:$0xff]  ;;  %v25_v15 = vld [vmem:[%s1103_s0 + $0x50] sm:$0xff] }
   0xd   :  { %588 = vmatmul.msk.f32.vlgmr.msra.gmra.mxu2 %vm36_vm1, %v23_v7  ;;  %592 = vmatmul.msk.f32.vlgmr.msra.gmra.mxu3 %vm36_vm1, %v27_v8  ;;  %v29_v16 = vld [vmem:[%s1103_s0 + $0x70] sm:$0xff]  ;;  %v18_v17 = vld [vmem:[%s1103_s0 + $0x18] sm:$0xff]  ;;  %vm156_vm2 = vcmp.lt.s32.totalorder %v776_v22, 8 }
   0xe   :  { %v22_v18 = vld [vmem:[%s1103_s0 + $0x38] sm:$0xff] }
   0xf   :  { %v26_v19 = vld [vmem:[%s1103_s0 + $0x58] sm:$0xff] }
  0x10   :  { %v30_v20 = vld [vmem:[%s1103_s0 + $0x78] sm:$0xff] }
  0x14   :  { %581 = vmatmul.msk.f32.gmra.mxu0 %vm36_vm1, %v16_v9  ;;  %585 = vmatmul.msk.f32.gmra.mxu1 %vm36_vm1, %v20_v10 }
  0x15   :  { %589 = vmatmul.msk.f32.gmra.mxu2 %vm36_vm1, %v24_v11  ;;  %593 = vmatmul.msk.f32.gmra.mxu3 %vm36_vm1, %v28_v12 }
  0x1c   :  { %582 = vmatmul.msk.f32.gmra.mxu0 %vm36_vm1, %v17_v13  ;;  %586 = vmatmul.msk.f32.gmra.mxu1 %vm36_vm1, %v21_v14 }
  0x1d   :  { %590 = vmatmul.msk.f32.gmra.mxu2 %vm36_vm1, %v25_v15  ;;  %594 = vmatmul.msk.f32.gmra.mxu3 %vm36_vm1, %v29_v16 }
  0x24   :  { %583 = vmatmul.msk.f32.gmra.mxu0 %vm36_vm1, %v18_v17  ;;  %587 = vmatmul.msk.f32.gmra.mxu1 %vm36_vm1, %v22_v18 }
  0x25   :  { %591 = vmatmul.msk.f32.gmra.mxu2 %vm36_vm1, %v26_v19  ;;  %595 = vmatmul.msk.f32.gmra.mxu3 %vm36_vm1, %v30_v20 }
  0x89   :  { %v106_v23 = vpop.f32.mrf.mxu0  ;;  %v118_v24 = vpop.f32.mrf.mxu1 }
  0x8a   :  { %v161_v25 = vsel %vm156_vm2, %v118_v24, 0.0  ;;  %v157_v26 = vsel %vm156_vm2, %v106_v23, 0.0 }
  0x8b   :  { %181 = vadd.xlane.f32.xlu2 %v161_v25  ;;  %173 = vadd.xlane.f32.xlu0 %v157_v26 }
  0x90   :  { %v130_v27 = vpop.f32.mrf.mxu2  ;;  %v142_v28 = vpop.f32.mrf.mxu3 }
  0x91   :  { %v165_v29 = vsel %vm156_vm2, %v130_v27, 0.0  ;;  %v169_v30 = vsel %vm156_vm2, %v142_v28, 0.0  ;;  %v787_v31 = vpop.f32.mrf.mxu0  ;;  %v789_v32 = vpop.f32.mrf.mxu1 }
  0x92   :  { %v162_v35 = vsel %vm156_vm2, %v789_v32, 0.0  ;;  %v158_v37 = vsel %vm156_vm2, %v787_v31, 0.0 }
  0x93   :  { %189 = vadd.xlane.f32.xlu2 %v165_v29  ;;  %197 = vadd.xlane.f32.xlu0 %v169_v30 }
  0x98   :  { %v791_v33 = vpop.f32.mrf.mxu2  ;;  %v793_v34 = vpop.f32.mrf.mxu3 }
  0x99   :  { %v170_v36 = vsel %vm156_vm2, %v793_v34, 0.0  ;;  %v804_v38 = vpop.f32.mrf.mxu0  ;;  %v166_v41 = vsel %vm156_vm2, %v791_v33, 0.0  ;;  %v816_v43 = vpop.f32.mrf.mxu1 }
  0x9a   :  { %199 = vadd.xlane.f32.xlu1 %v170_v36  ;;  %v159_v39 = vsel %vm156_vm2, %v804_v38, 0.0  ;;  %v163_v46 = vsel %vm156_vm2, %v816_v43, 0.0 }
  0x9b   :  { %183 = vadd.xlane.f32.xlu2 %v162_v35  ;;  %175 = vadd.xlane.f32.xlu0 %v158_v37 }
  0xa0   :  { %v809_v40 = vpop.f32.mrf.mxu2  ;;  %v814_v42 = vpop.f32.mrf.mxu3 }
  0xa1   :  { %v167_v44 = vsel %vm156_vm2, %v809_v40, 0.0  ;;  %v829_v48 = vpop.f32.mrf.mxu0  ;;  %v171_v50 = vsel %vm156_vm2, %v814_v42, 0.0  ;;  %v842_v53 = vpop.f32.mrf.mxu1 }
  0xa2   :  { %177 = vadd.xlane.f32.xlu1 %v159_v39  ;;  %v160_v51 = vsel %vm156_vm2, %v829_v48, 0.0  ;;  %v164_v54 = vsel %vm156_vm2, %v842_v53, 0.0 }
  0xa3   :  { %191 = vadd.xlane.f32.xlu0 %v166_v41 }
  0xa8   :  { %v821_v45 = vpop.f32.mrf.mxu2  ;;  %v831_v49 = vpop.f32.mrf.mxu3 }
  0xa9   :  { %v168_v47 = vsel %vm156_vm2, %v821_v45, 0.0  ;;  %v172_v52 = vsel %vm156_vm2, %v831_v49, 0.0 }
  0xaa   :  { %195 = vadd.xlane.f32.xlu2 %v168_v47  ;;  %193 = vadd.xlane.f32.xlu1 %v167_v44 }
  0xab   :  { %185 = vadd.xlane.f32.xlu0 %v163_v46 }
  0xb2   :  { %201 = vadd.xlane.f32.xlu2 %v171_v50  ;;  %179 = vadd.xlane.f32.xlu1 %v160_v51 }
  0xb3   :  { %203 = vadd.xlane.f32.xlu0 %v172_v52 }
  0xba   :  { %187 = vadd.xlane.f32.xlu1 %v164_v54 }
  0xfe   :  { %v182_v55 = vpop.xlane.xlu2 %181  ;;  %v174_v56 = vpop.xlane.xlu0 %173 }
  0xff   :  { %v209_v57 = vmul.f32 0.125, %v182_v55  ;;  %v205_v58 = vmul.f32 0.125, %v174_v56 }
 0x101   :  { %v225_v59 = vsub.f32 %v118_v24, %v209_v57  ;;  %v221_v60 = vsub.f32 %v106_v23, %v205_v58 }
 0x103   :  { %v849_v61 = vsel %vm156_vm2, %v225_v59, 0.0  ;;  %v853_v62 = vsel %vm156_vm2, %v221_v60, 0.0 }
 0x104   :  { %v257_v63 = vmul.f32 %v849_v61, %v849_v61  ;;  %v253_v0 = vmul.f32 %v853_v62, %v853_v62 }
 0x106   :  { %v190_v1 = vpop.xlane.xlu2 %189  ;;  %277 = vadd.xlane.f32.xlu2 %v257_v63  ;;  %v198_v2 = vpop.xlane.xlu0 %197  ;;  %269 = vadd.xlane.f32.xlu1 %v253_v0 }
 0x107   :  { %v213_v3 = vmul.f32 0.125, %v190_v1  ;;  %v217_v4 = vmul.f32 0.125, %v198_v2 }
 0x109   :  { %v229_v5 = vsub.f32 %v130_v27, %v213_v3  ;;  %v233_v6 = vsub.f32 %v142_v28, %v217_v4 }
 0x10b   :  { %v861_v7 = vsel %vm156_vm2, %v229_v5, 0.0  ;;  %v865_v8 = vsel %vm156_vm2, %v233_v6, 0.0 }
 0x10c   :  { %v261_v9 = vmul.f32 %v861_v7, %v861_v7  ;;  %v265_v10 = vmul.f32 %v865_v8, %v865_v8 }
 0x10d   :  { %v200_v11 = vpop.xlane.xlu1 %199 }
 0x10e   :  { %v184_v12 = vpop.xlane.xlu2 %183  ;;  %285 = vadd.xlane.f32.xlu0 %v261_v9  ;;  %v176_v13 = vpop.xlane.xlu0 %175  ;;  %293 = vadd.xlane.f32.xlu1 %v265_v10 }
 0x10f   :  { %v210_v14 = vmul.f32 0.125, %v184_v12  ;;  %v206_v15 = vmul.f32 0.125, %v176_v13 }
 0x111   :  { %v226_v16 = vsub.f32 %v789_v32, %v210_v14  ;;  %v222_v17 = vsub.f32 %v787_v31, %v206_v15 }
 0x113   :  { %v875_v18 = vsel %vm156_vm2, %v226_v16, 0.0  ;;  %v879_v19 = vsel %vm156_vm2, %v222_v17, 0.0 }
 0x114   :  { %v258_v20 = vmul.f32 %v875_v18, %v875_v18  ;;  %v254_v21 = vmul.f32 %v879_v19, %v879_v19 }
 0x115   :  { %v178_v23 = vpop.xlane.xlu1 %177 }
 0x116   :  { %v207_v24 = vmul.f32 0.125, %v178_v23  ;;  %279 = vadd.xlane.f32.xlu0 %v258_v20  ;;  %271 = vadd.xlane.f32.xlu2 %v254_v21  ;;  %v192_v25 = vpop.xlane.xlu0 %191 }
 0x117   :  { %v214_v26 = vmul.f32 0.125, %v192_v25 }
 0x118   :  { %v223_v27 = vsub.f32 %v804_v38, %v207_v24 }
 0x119   :  { %v230_v28 = vsub.f32 %v791_v33, %v214_v26 }
 0x11a   :  { %v889_v29 = vsel %vm156_vm2, %v223_v27, 0.0 }
 0x11b   :  { %v893_v30 = vsel %vm156_vm2, %v230_v28, 0.0  ;;  %v255_v31 = vmul.f32 %v889_v29, %v889_v29 }
 0x11c   :  { %v262_v32 = vmul.f32 %v893_v30, %v893_v30 }
 0x11d   :  { %v196_v35 = vpop.xlane.xlu2 %195  ;;  %v194_v36 = vpop.xlane.xlu1 %193 }
 0x11e   :  { %v216_v37 = vmul.f32 0.125, %v196_v35  ;;  %v215_v38 = vmul.f32 0.125, %v194_v36  ;;  %v186_v39 = vpop.xlane.xlu0 %185  ;;  %273 = vadd.xlane.f32.xlu0 %v255_v31  ;;  %287 = vadd.xlane.f32.xlu1 %v262_v32 }
 0x11f   :  { %v211_v33 = vmul.f32 0.125, %v186_v39 }
 0x120   :  { %v232_v41 = vsub.f32 %v821_v45, %v216_v37  ;;  %v231_v44 = vsub.f32 %v809_v40, %v215_v38 }
 0x121   :  { %v227_v46 = vsub.f32 %v816_v43, %v211_v33 }
 0x122   :  { %v904_v47 = vsel %vm156_vm2, %v231_v44, 0.0  ;;  %v908_v50 = vsel %vm156_vm2, %v232_v41, 0.0 }
 0x123   :  { %v263_v51 = vmul.f32 %v904_v47, %v904_v47  ;;  %v914_v52 = vsel %vm156_vm2, %v227_v46, 0.0  ;;  %v264_v40 = vmul.f32 %v908_v50, %v908_v50 }
 0x124   :  { %v259_v43 = vmul.f32 %v914_v52, %v914_v52 }
 0x125   :  { %v202_v45 = vpop.xlane.xlu2 %201  ;;  %289 = vadd.xlane.f32.xlu2 %v263_v51  ;;  %v180_v54 = vpop.xlane.xlu1 %179 }
 0x126   :  { %v219_v55 = vmul.f32 0.125, %v202_v45  ;;  %v208_v56 = vmul.f32 0.125, %v180_v54  ;;  %v204_v57 = vpop.xlane.xlu0 %203  ;;  %291 = vadd.xlane.f32.xlu0 %v264_v40  ;;  %281 = vadd.xlane.f32.xlu1 %v259_v43 }
 0x127   :  { %v220_v60 = vmul.f32 0.125, %v204_v57 }
 0x128   :  { %v235_v58 = vsub.f32 %v814_v42, %v219_v55  ;;  %v224_v59 = vsub.f32 %v829_v48, %v208_v56  ;;  %v218_v48 = vmul.f32 0.125, %v200_v11  ;;  %v969_v56 = vld [vmem:[%s1105_s2] ss:$0 sm:$0xff] }
 0x129   :  { %v236_v3 = vsub.f32 %v831_v49, %v220_v60 }
 0x12a   :  { %v924_v63 = vsel %vm156_vm2, %v235_v58, 0.0  ;;  %v928_v0 = vsel %vm156_vm2, %v224_v59, 0.0  ;;  %v234_v49 = vsub.f32 %v793_v34, %v218_v48 }
 0x12b   :  { %v267_v1 = vmul.f32 %v924_v63, %v924_v63  ;;  %v256_v2 = vmul.f32 %v928_v0, %v928_v0  ;;  %v938_v6 = vsel %vm156_vm2, %v236_v3, 0.0 }
 0x12c   :  { %v268_v12 = vmul.f32 %v938_v6, %v938_v6 }
 0x12d   :  { %v188_v42 = vpop.xlane.xlu1 %187 }
 0x12e   :  { %v212_v4 = vmul.f32 0.125, %v188_v42  ;;  %297 = vadd.xlane.f32.xlu0 %v267_v1  ;;  %275 = vadd.xlane.f32.xlu1 %v256_v2  ;;  %v977_v1 = vld [vmem:[%s1105_s2 + $0x1] ss:$0 sm:$0xff]  ;;  %s674_s2 = smov [#allocation2]  }
 0x12f   :  { %s565_s28 = sshll.u32 %s674_s2, 4  ;;  %s566_s28 = int_to_ptr.vmem [resolvable:$true] %s565_s28 }
 0x130   :  { %v228_v5 = vsub.f32 %v842_v53, %v212_v4  ;;  %v951_v53 = vsel %vm156_vm2, %v234_v49, 0.0 }
 0x131   :  { %v266_v11 = vmul.f32 %v951_v53, %v951_v53 }
 0x132   :  { %v942_v9 = vsel %vm156_vm2, %v228_v5, 0.0 }
 0x133   :  { %v260_v10 = vmul.f32 %v942_v9, %v942_v9 }
 0x135   :  { %283 = vadd.xlane.f32.xlu2 %v260_v10 }
 0x136   :  { %299 = vadd.xlane.f32.xlu1 %v268_v12 }
 0x13d   :  { %295 = vadd.xlane.f32.xlu2 %v266_v11 }
 0x179   :  { %v278_v13 = vpop.xlane.xlu2 %277  ;;  %v270_v14 = vpop.xlane.xlu1 %269 }
 0x17a   :  { %v305_v15 = vmul.f32 0.125, %v278_v13  ;;  %v301_v16 = vmul.f32 0.125, %v270_v14 }
 0x17c   :  { %v321_v17 = vadd.f32 1e-05, %v305_v15  ;;  %v317_v20 = vadd.f32 1e-05, %v301_v16 }
 0x17e   :  { %616 = vrsqrt.f32 %v321_v17  ;;  %vm379_vm5 = vweird.f32 %v321_v17  ;;  %vm339_vm7 = vweird.f32 %v317_v20 }
 0x17f   :  { %618 = vrsqrt.f32 %v317_v20 }
 0x181   :  { %v286_v34 = vpop.xlane.xlu0 %285  ;;  %v294_v21 = vpop.xlane.xlu1 %293 }
 0x182   :  { %v309_v23 = vmul.f32 0.125, %v286_v34  ;;  %v313_v24 = vmul.f32 0.125, %v294_v21 }
 0x184   :  { %v617_v25 = vpop.eup %616  ;;  %v955_v22 = vadd.f32 1e-05, %v309_v23  ;;  %v957_v26 = vadd.f32 1e-05, %v313_v24 }
 0x185   :  { %v619_v27 = vpop.eup %618  ;;  %v374_v28 = vmul.f32 %v617_v25, %v321_v17  ;;  %vm380_vm3 = vweird.f32 %v617_v25 }
 0x186   :  { %v334_v31 = vmul.f32 %v619_v27, %v317_v20  ;;  %620 = vrsqrt.f32 %v955_v22  ;;  %vm340_vm4 = vweird.f32 %v619_v27  ;;  %vm381_vm6 = vmor %vm379_vm5, %vm380_vm3  ;;  %vm419_vm11 = vweird.f32 %v955_v22 }
 0x187   :  { %v375_v32 = vmul.f32 %v617_v25, %v374_v28  ;;  %622 = vrsqrt.f32 %v957_v26  ;;  %vm341_vm8 = vmor %vm339_vm7, %vm340_vm4  ;;  %vm459_vm13 = vweird.f32 %v957_v26 }
 0x188   :  { %v335_v35 = vmul.f32 %v619_v27, %v334_v31 }
 0x189   :  { %v376_v36 = vmul.f32 0.5, %v375_v32  ;;  %v272_v37 = vpop.xlane.xlu2 %271  ;;  %v280_v38 = vpop.xlane.xlu0 %279 }
 0x18a   :  { %v336_v39 = vmul.f32 0.5, %v335_v35  ;;  %v302_v33 = vmul.f32 0.125, %v272_v37  ;;  %v306_v41 = vmul.f32 0.125, %v280_v38 }
 0x18b   :  { %v377_v44 = vsub.f32 1.5, %v376_v36 }
 0x18c   :  { %v621_v46 = vpop.eup %620  ;;  %v337_v51 = vsub.f32 1.5, %v336_v39  ;;  %v961_v40 = vadd.f32 1e-05, %v302_v33  ;;  %v963_v43 = vadd.f32 1e-05, %v306_v41 }
 0x18d   :  { %v623_v45 = vpop.eup %622  ;;  %v378_v54 = vmul.f32 %v617_v25, %v377_v44  ;;  %v414_v55 = vmul.f32 %v621_v46, %v955_v22  ;;  %vm420_vm9 = vweird.f32 %v621_v46 }
 0x18e   :  { %v338_v57 = vmul.f32 %v619_v27, %v337_v51  ;;  %v454_v58 = vmul.f32 %v623_v45, %v957_v26  ;;  %624 = vrsqrt.f32 %v961_v40  ;;  %vm460_vm10 = vweird.f32 %v623_v45  ;;  %vm421_vm12 = vmor %vm419_vm11, %vm420_vm9 }
 0x18f   :  { %v382_v59 = vsel %vm381_vm6, %v617_v25, %v378_v54  ;;  %v415_v60 = vmul.f32 %v621_v46, %v414_v55  ;;  %626 = vrsqrt.f32 %v963_v43  ;;  %vm461_vm14 = vmor %vm459_vm13, %vm460_vm10  ;;  %vm349_vm15 = vweird.f32 %v961_v40 }
 0x190   :  { %v497_v2 = vmul.f32 %v382_v59, %v849_v61  ;;  %v342_v3 = vsel %vm341_vm8, %v619_v27, %v338_v57  ;;  %v455_v42 = vmul.f32 %v623_v45, %v454_v58  ;;  %vm389_vm3 = vweird.f32 %v963_v43 }
 0x191   :  { %v493_v4 = vmul.f32 %v342_v3, %v853_v62  ;;  %v416_v48 = vmul.f32 0.5, %v415_v60  ;;  %v274_v5 = vpop.xlane.xlu0 %273  ;;  %v288_v10 = vpop.xlane.xlu1 %287 }
 0x192   :  { %v515_v49 = vmul.f32 %v969_v56, %v497_v2  ;;  %v456_v12 = vmul.f32 0.5, %v455_v42  ;;  %v303_v11 = vmul.f32 0.125, %v274_v5  ;;  %v310_v13 = vmul.f32 0.125, %v288_v10 }
 0x193   :  { %v511_v14 = vmul.f32 %v969_v56, %v493_v4  ;;  %v417_v15 = vsub.f32 1.5, %v416_v48 }
 0x194   :  { %v625_v16 = vpop.eup %624  ;;  %v533_v61 = vadd.f32 %v977_v1, %v515_v49  ;;  %v457_v17 = vsub.f32 1.5, %v456_v12  ;;  %v984_v20 = vadd.f32 1e-05, %v303_v11  ;;  %v986_v62 = vadd.f32 1e-05, %v310_v13 }
 0x195   :  { %v627_v34 = vpop.eup %626  ;;  %v529_v21 = vadd.f32 %v977_v1, %v511_v14  ;;  %v418_v23 = vmul.f32 %v621_v46, %v417_v15  ;;  %v344_v24 = vmul.f32 %v625_v16, %v961_v40  ;;  %vm350_vm0 = vweird.f32 %v625_v16 }
 0x196   :  { %549 = vst [vmem:[#allocation2 + $0x20] sm:$0xff] %v533_v61  ;;  %v458_v25 = vmul.f32 %v623_v45, %v457_v17  ;;  %v384_v27 = vmul.f32 %v627_v34, %v963_v43  ;;  %628 = vrsqrt.f32 %v984_v20  ;;  %vm390_vm1 = vweird.f32 %v627_v34  ;;  %vm351_vm2 = vmor %vm349_vm15, %vm350_vm0 }
 0x197   :  { %545 = vst [vmem:[#allocation2] sm:$0xff] %v529_v21  ;;  %v422_v28 = vsel %vm421_vm12, %v621_v46, %v418_v23  ;;  %v345_v31 = vmul.f32 %v625_v16, %v344_v24  ;;  %630 = vrsqrt.f32 %v986_v62  ;;  %vm391_vm4 = vmor %vm389_vm3, %vm390_vm1  ;;  %vm359_vm7 = vweird.f32 %v984_v20 }
 0x198   :  { %v501_v22 = vmul.f32 %v422_v28, %v861_v7  ;;  %v462_v32 = vsel %vm461_vm14, %v623_v45, %v458_v25  ;;  %v385_v35 = vmul.f32 %v627_v34, %v384_v27  ;;  %v290_v36 = vpop.xlane.xlu2 %289  ;;  %vm429_vm9 = vweird.f32 %v986_v62 }
 0x199   :  { %v505_v37 = vmul.f32 %v462_v32, %v865_v8  ;;  %v346_v38 = vmul.f32 0.5, %v345_v31  ;;  %v311_v26 = vmul.f32 0.125, %v290_v36  ;;  %v292_v39 = vpop.xlane.xlu0 %291  ;;  %v282_v33 = vpop.xlane.xlu1 %281 }
 0x19a   :  { %v519_v41 = vmul.f32 %v969_v56, %v501_v22  ;;  %v386_v44 = vmul.f32 0.5, %v385_v35  ;;  %v312_v46 = vmul.f32 0.125, %v292_v39  ;;  %v307_v51 = vmul.f32 0.125, %v282_v33 }
 0x19b   :  { %v523_v54 = vmul.f32 %v969_v56, %v505_v37  ;;  %v347_v55 = vsub.f32 1.5, %v346_v38  ;;  %v1001_v7 = vadd.f32 1e-05, %v311_v26 }
 0x19c   :  { %v629_v45 = vpop.eup %628  ;;  %v537_v8 = vadd.f32 %v977_v1, %v519_v41  ;;  %v387_v57 = vsub.f32 1.5, %v386_v44  ;;  %v1004_v58 = vadd.f32 1e-05, %v312_v46  ;;  %v1008_v42 = vadd.f32 1e-05, %v307_v51 }
 0x19d   :  { %v631_v59 = vpop.eup %630  ;;  %v541_v60 = vadd.f32 %v977_v1, %v523_v54  ;;  %v348_v2 = vmul.f32 %v625_v16, %v347_v55  ;;  %v354_v3 = vmul.f32 %v629_v45, %v984_v20  ;;  %632 = vrsqrt.f32 %v1001_v7 }
 0x19e   :  { %553 = vst [vmem:[#allocation2 + $0x40] sm:$0xff] %v537_v8  ;;  %v388_v4 = vmul.f32 %v627_v34, %v387_v57  ;;  %v424_v48 = vmul.f32 %v631_v59, %v986_v62  ;;  %634 = vrsqrt.f32 %v1004_v58  ;;  %vm360_vm5 = vweird.f32 %v629_v45 }
 0x19f   :  { %557 = vst [vmem:[#allocation2 + $0x60] sm:$0xff] %v541_v60  ;;  %v352_v5 = vsel %vm351_vm2, %v625_v16, %v348_v2  ;;  %v355_v10 = vmul.f32 %v629_v45, %v354_v3  ;;  %636 = vrsqrt.f32 %v1008_v42  ;;  %vm430_vm6 = vweird.f32 %v631_v59  ;;  %vm361_vm8 = vmor %vm359_vm7, %vm360_vm5 }
 0x1a0   :  { %v494_v49 = vmul.f32 %v352_v5, %v879_v19  ;;  %v392_v12 = vsel %vm391_vm4, %v627_v34, %v388_v4  ;;  %v425_v11 = vmul.f32 %v631_v59, %v424_v48  ;;  %vm431_vm10 = vmor %vm429_vm9, %vm430_vm6  ;;  %vm439_vm11 = vweird.f32 %v1001_v7 }
 0x1a1   :  { %v498_v40 = vmul.f32 %v392_v12, %v875_v18  ;;  %v356_v13 = vmul.f32 0.5, %v355_v10  ;;  %v298_v43 = vpop.xlane.xlu0 %297  ;;  %v276_v14 = vpop.xlane.xlu1 %275  ;;  %vm449_vm12 = vweird.f32 %v1004_v58  ;;  %vm399_vm2 = vweird.f32 %v1008_v42 }
 0x1a2   :  { %v512_v15 = vmul.f32 %v969_v56, %v494_v49  ;;  %v426_v61 = vmul.f32 0.5, %v425_v11  ;;  %v315_v16 = vmul.f32 0.125, %v298_v43  ;;  %v304_v17 = vmul.f32 0.125, %v276_v14 }
 0x1a3   :  { %v516_v21 = vmul.f32 %v969_v56, %v498_v40  ;;  %v357_v23 = vsub.f32 1.5, %v356_v13  ;;  %v1022_v19 = vpop.eup %632 }
 0x1a4   :  { %v530_v34 = vadd.f32 %v977_v1, %v512_v15  ;;  %v427_v18 = vsub.f32 1.5, %v426_v61  ;;  %v1025_v24 = vadd.f32 1e-05, %v315_v16  ;;  %v1027_v25 = vadd.f32 1e-05, %v304_v17  ;;  %v1029_v27 = vpop.eup %634 }
 0x1a5   :  { %v534_v28 = vadd.f32 %v977_v1, %v516_v21  ;;  %v358_v31 = vmul.f32 %v629_v45, %v357_v23  ;;  %v434_v22 = vmul.f32 %v1022_v19, %v1001_v7  ;;  %v444_v35 = vmul.f32 %v1029_v27, %v1004_v58  ;;  %v637_v36 = vpop.eup %636 }
 0x1a6   :  { %546 = vst [vmem:[#allocation2 + $0x8] sm:$0xff] %v530_v34  ;;  %v428_v32 = vmul.f32 %v631_v59, %v427_v18  ;;  %638 = vrsqrt.f32 %v1025_v24  ;;  %v394_v62 = vmul.f32 %v637_v36, %v1008_v42  ;;  %vm440_vm13 = vweird.f32 %v1022_v19 }
 0x1a7   :  { %550 = vst [vmem:[#allocation2 + $0x28] sm:$0xff] %v534_v28  ;;  %v362_v37 = vsel %vm361_vm8, %v629_v45, %v358_v31  ;;  %v435_v20 = vmul.f32 %v1022_v19, %v434_v22  ;;  %640 = vrsqrt.f32 %v1027_v25  ;;  %v445_v39 = vmul.f32 %v1029_v27, %v444_v35  ;;  %vm441_vm15 = vmor %vm439_vm11, %vm440_vm13 }
 0x1a8   :  { %v495_v38 = vmul.f32 %v362_v37, %v889_v29  ;;  %v432_v26 = vsel %vm431_vm10, %v631_v59, %v428_v32  ;;  %v284_v33 = vpop.xlane.xlu2 %283  ;;  %v395_v54 = vmul.f32 %v637_v36, %v394_v62  ;;  %vm450_vm14 = vweird.f32 %v1029_v27 }
 0x1a9   :  { %v502_v41 = vmul.f32 %v432_v26, %v893_v30  ;;  %v436_v44 = vmul.f32 0.5, %v435_v20  ;;  %v446_v51 = vmul.f32 0.5, %v445_v39  ;;  %v308_v55 = vmul.f32 0.125, %v284_v33  ;;  %v300_v45 = vpop.xlane.xlu1 %299  ;;  %vm451_vm1 = vmor %vm449_vm12, %vm450_vm14 }
 0x1aa   :  { %v513_v46 = vmul.f32 %v969_v56, %v495_v38  ;;  %v396_v60 = vmul.f32 0.5, %v395_v54  ;;  %v316_v10 = vmul.f32 0.125, %v300_v45  ;;  %vm400_vm0 = vweird.f32 %v637_v36 }
 0x1ab   :  { %v520_v29 = vmul.f32 %v969_v56, %v502_v41  ;;  %v437_v8 = vsub.f32 1.5, %v436_v44  ;;  %v447_v59 = vsub.f32 1.5, %v446_v51  ;;  %v1053_v2 = vadd.f32 1e-05, %v308_v55  ;;  %vm401_vm3 = vmor %vm399_vm2, %vm400_vm0 }
 0x1ac   :  { %v639_v57 = vpop.eup %638  ;;  %v531_v30 = vadd.f32 %v977_v1, %v513_v46  ;;  %v397_v12 = vsub.f32 1.5, %v396_v60  ;;  %v332_v21 = vadd.f32 1e-05, %v316_v10  ;;  %vm479_vm6 = vweird.f32 %v1025_v24 }
 0x1ad   :  { %v641_v3 = vpop.eup %640  ;;  %v538_v4 = vadd.f32 %v977_v1, %v520_v29  ;;  %v438_v48 = vmul.f32 %v1022_v19, %v437_v8  ;;  %v474_v5 = vmul.f32 %v639_v57, %v1025_v24  ;;  %v448_v49 = vmul.f32 %v1029_v27, %v447_v59 }
 0x1ae   :  { %547 = vst [vmem:[#allocation2 + $0x10] sm:$0xff] %v531_v30  ;;  %v364_v11 = vmul.f32 %v641_v3, %v1027_v25  ;;  %642 = vrsqrt.f32 %v1053_v2  ;;  %v398_v14 = vmul.f32 %v637_v36, %v397_v12  ;;  %vm480_vm4 = vweird.f32 %v639_v57 }
 0x1af   :  { %554 = vst [vmem:[#allocation2 + $0x48] sm:$0xff] %v538_v4  ;;  %v442_v40 = vsel %vm441_vm15, %v1022_v19, %v438_v48  ;;  %v475_v13 = vmul.f32 %v639_v57, %v474_v5  ;;  %v452_v43 = vsel %vm451_vm1, %v1029_v27, %v448_v49  ;;  %644 = vrsqrt.f32 %v332_v21  ;;  %vm481_vm7 = vmor %vm479_vm6, %vm480_vm4 }
 0x1b0   :  { %v503_v7 = vmul.f32 %v442_v40, %v904_v47  ;;  %v365_v15 = vmul.f32 %v641_v3, %v364_v11  ;;  %v296_v61 = vpop.xlane.xlu2 %295  ;;  %v504_v16 = vmul.f32 %v452_v43, %v908_v50  ;;  %v402_v19 = vsel %vm401_vm3, %v637_v36, %v398_v14 }
 0x1b1   :  { %v476_v17 = vmul.f32 0.5, %v475_v13  ;;  %v314_v23 = vmul.f32 0.125, %v296_v61  ;;  %v499_v47 = vmul.f32 %v402_v19, %v914_v52  ;;  %vm370_vm5 = vweird.f32 %v641_v3 }
 0x1b2   :  { %v521_v58 = vmul.f32 %v969_v56, %v503_v7  ;;  %v366_v42 = vmul.f32 0.5, %v365_v15  ;;  %v522_v34 = vmul.f32 %v969_v56, %v504_v16  ;;  %vm369_vm8 = vweird.f32 %v1027_v25 }
 0x1b3   :  { %v477_v18 = vsub.f32 1.5, %v476_v17  ;;  %v330_v50 = vadd.f32 1e-05, %v314_v23  ;;  %v517_v32 = vmul.f32 %v969_v56, %v499_v47  ;;  %vm371_vm9 = vmor %vm369_vm8, %vm370_vm5  ;;  %vm409_vm11 = vweird.f32 %v1053_v2 }
 0x1b4   :  { %v539_v27 = vadd.f32 %v977_v1, %v521_v58  ;;  %v367_v28 = vsub.f32 1.5, %v366_v42  ;;  %v643_v31 = vpop.eup %642  ;;  %v540_v22 = vadd.f32 %v977_v1, %v522_v34  ;;  %vm489_vm14 = vweird.f32 %v332_v21 }
 0x1b5   :  { %v478_v35 = vmul.f32 %v639_v57, %v477_v18  ;;  %v404_v52 = vmul.f32 %v643_v31, %v1053_v2  ;;  %646 = vrsqrt.f32 %v330_v50  ;;  %v535_v37 = vadd.f32 %v977_v1, %v517_v32  ;;  %v645_v24 = vpop.eup %644 }
 0x1b6   :  { %555 = vst [vmem:[#allocation2 + $0x50] sm:$0xff] %v539_v27  ;;  %v368_v36 = vmul.f32 %v641_v3, %v367_v28  ;;  %v484_v41 = vmul.f32 %v645_v24, %v332_v21  ;;  %vm410_vm10 = vweird.f32 %v643_v31  ;;  %vm490_vm13 = vweird.f32 %v645_v24 }
 0x1b7   :  { %556 = vst [vmem:[#allocation2 + $0x58] sm:$0xff] %v540_v22  ;;  %v482_v20 = vsel %vm481_vm7, %v639_v57, %v478_v35  ;;  %v405_v39 = vmul.f32 %v643_v31, %v404_v52  ;;  %vm411_vm12 = vmor %vm409_vm11, %vm410_vm10  ;;  %vm469_vm1 = vweird.f32 %v330_v50 }
 0x1b8   :  { %v507_v38 = vmul.f32 %v482_v20, %v924_v63  ;;  %v372_v26 = vsel %vm371_vm9, %v641_v3, %v368_v36  ;;  %551 = vst [vmem:[#allocation2 + $0x30] sm:$0xff] %v535_v37  ;;  %v485_v55 = vmul.f32 %v645_v24, %v484_v41  ;;  %vm491_vm15 = vmor %vm489_vm14, %vm490_vm13 }
 0x1b9   :  { %v496_v62 = vmul.f32 %v372_v26, %v928_v0  ;;  %v406_v25 = vmul.f32 0.5, %v405_v39 }
 0x1ba   :  { %v525_v33 = vmul.f32 %v969_v56, %v507_v38  ;;  %v486_v0 = vmul.f32 0.5, %v485_v55 }
 0x1bb   :  { %v514_v44 = vmul.f32 %v969_v56, %v496_v62  ;;  %v647_v46 = vpop.eup %646  ;;  %v407_v54 = vsub.f32 1.5, %v406_v25 }
 0x1bc   :  { %v543_v51 = vadd.f32 %v977_v1, %v525_v33  ;;  %v464_v45 = vmul.f32 %v647_v46, %v330_v50  ;;  %v487_v30 = vsub.f32 1.5, %v486_v0  ;;  %vm470_vm0 = vweird.f32 %v647_v46 }
 0x1bd   :  { %v532_v63 = vadd.f32 %v977_v1, %v514_v44  ;;  %v408_v29 = vmul.f32 %v643_v31, %v407_v54  ;;  %vm471_vm2 = vmor %vm469_vm1, %vm470_vm0 }
 0x1be   :  { %559 = vst [vmem:[#allocation2 + $0x70] sm:$0xff] %v543_v51  ;;  %v465_v8 = vmul.f32 %v647_v46, %v464_v45  ;;  %v488_v3 = vmul.f32 %v645_v24, %v487_v30 }
 0x1bf   :  { %548 = vst [vmem:[#allocation2 + $0x18] sm:$0xff] %v532_v63  ;;  %v412_v57 = vsel %vm411_vm12, %v643_v31, %v408_v29 }
 0x1c0   :  { %v500_v59 = vmul.f32 %v412_v57, %v942_v9  ;;  %v466_v60 = vmul.f32 0.5, %v465_v8  ;;  %v492_v5 = vsel %vm491_vm15, %v645_v24, %v488_v3 }
 0x1c1   :  { %v508_v10 = vmul.f32 %v492_v5, %v938_v6 }
 0x1c2   :  { %v518_v4 = vmul.f32 %v969_v56, %v500_v59  ;;  %v467_v48 = vsub.f32 1.5, %v466_v60 }
 0x1c3   :  { %v526_v12 = vmul.f32 %v969_v56, %v508_v10 }
 0x1c4   :  { %v536_v2 = vadd.f32 %v977_v1, %v518_v4  ;;  %v468_v49 = vmul.f32 %v647_v46, %v467_v48 }
 0x1c5   :  { %v544_v40 = vadd.f32 %v977_v1, %v526_v12 }
 0x1c6   :  { %552 = vst [vmem:[#allocation2 + $0x38] sm:$0xff] %v536_v2  ;;  %v472_v9 = vsel %vm471_vm2, %v647_v46, %v468_v49 }
 0x1c7   :  { %v506_v11 = vmul.f32 %v472_v9, %v951_v53  ;;  %560 = vst [vmem:[#allocation2 + $0x78] sm:$0xff] %v544_v40 }
 0x1c9   :  { %v524_v13 = vmul.f32 %v969_v56, %v506_v11 }
 0x1cb   :  { %v542_v6 = vadd.f32 %v977_v1, %v524_v13 }
 0x1cd   :  { %558 = vst [vmem:[#allocation2 + $0x68] sm:$0xff] %v542_v6 }
 0x1ce   :  { %573 = dma.vmem_to_hbm [thread:$0]  %s566_s28, 2048, %s568_s4, [#allocation3], %s675_s5, %s675_s5, %s676_s6  }
 0x1cf   :  { %672 = dma.done.wait [#allocation3], 2048  }
 0x1d0   :  { %673 = vsyncadd [#allocation3], 4294965248 }
 0x1d1   :  { %578 = vsyncpa [#allocation3], 1 }

</bundles_post_ra>
